<compile_context>
chip_gen: v6e
topology: v6e:2x2x1
jax: 0.10.0
libtpu: 0.0.40
codegen_flags: <defaults>
</compile_context>

<pallas_src>
import jax
import jax.numpy as jnp
from jax.experimental import pallas as pl
from jax.experimental.pallas import tpu as pltpu


# ----------------------------------------------------------------------------
# Fused per-image kernel factory (C, H, W are static)
# ----------------------------------------------------------------------------
def _make_block_kernel(C, H, W):
    HW = H * W
    P = W + 1                               # halo width on each side of the flat image
    inv_hw = 1.0 / float(HW)
    inv_cm1 = 1.0 / float(max(C - 1, 1))    # torch .var() is unbiased; guard C == 1

    def norm_act(h, gamma, alpha, beta):
        # ConditionalInstanceNorm2dPlus + ELU.  h: (C, HW) f32, gamma/alpha/beta: (C, 1).
        # Per-channel spatial stats in a single sum / sum-of-squares pass.
        s = jnp.sum(h, axis=1, keepdims=True)                 # (C, 1)
        ss = jnp.sum(h * h, axis=1, keepdims=True)            # (C, 1)
        mean = s * inv_hw
        var = ss * inv_hw - mean * mean                       # biased (InstanceNorm2d)
        hn = (h - mean) * jax.lax.rsqrt(var + 1e-5)
        # "Plus" part: normalize the per-channel means across channels (unbiased var).
        m = jnp.mean(mean, axis=0, keepdims=True)             # (1, 1)
        d = mean - m
        v = jnp.sum(d * d, axis=0, keepdims=True) * inv_cm1   # (1, 1)
        means_n = d * jax.lax.rsqrt(v + 1e-5)                  # (C, 1)
        out = gamma * (hn + means_n * alpha) + beta
        # ELU(alpha=1).  exp(x)-1 (not expm1) to match the f32 reference bit-for-bit-ish.
        return jnp.where(out > 0, out, jnp.exp(out) - 1.0)

    def kernel(x_ref, emb_ref, w1_ref, w2_ref, b_ref, o_ref, hp_ref, patch_ref):
        x = x_ref[0].astype(jnp.float32)                      # (C, HW)
        emb = emb_ref[0].astype(jnp.float32)                  # (C, 6) = [g1,a1,b1,g2,a2,b2]
        # w-coordinate of every flattened pixel, for horizontal halo masking.
        col = jax.lax.broadcasted_iota(jnp.int32, (1, HW), 1) % W

        # Zero the halo once per image; both convs only overwrite the interior.
        hp_ref[...] = jnp.zeros_like(hp_ref)

        def conv3x3(h, w_ref, bias):
            # 3x3, stride 1, pad 1 as ONE im2col contraction with K = 9*C
            # (no jnp.pad, no per-tap reshape relayouts).
            hp_ref[:, P:P + HW] = h                           # interior of halo buffer
            t = 0
            for dy in (-1, 0, 1):
                for dx in (-1, 0, 1):
                    off = dy * W + dx
                    tap = hp_ref[:, P + off:P + off + HW]     # (C, HW) shifted view
                    if dx == -1:                              # mask row-wrap at w == 0
                        tap = jnp.where(col == 0, 0.0, tap)
                    elif dx == 1:                             # mask row-wrap at w == W-1
                        tap = jnp.where(col == W - 1, 0.0, tap)
                    patch_ref[t * C:(t + 1) * C, :] = tap
                    t += 1
            out = jnp.dot(w_ref[...].astype(jnp.float32), patch_ref[...],
                          preferred_element_type=jnp.float32)  # (C, HW), lane-dense
            return out + bias

        h = norm_act(x, emb[:, 0:1], emb[:, 1:2], emb[:, 2:3])        # normalize1 + ELU
        h = conv3x3(h, w1_ref, b_ref[:, 0:1].astype(jnp.float32))     # conv1
        h = norm_act(h, emb[:, 3:4], emb[:, 4:5], emb[:, 5:6])        # normalize2 + ELU
        h = conv3x3(h, w2_ref, b_ref[:, 1:2].astype(jnp.float32))     # conv2
        o_ref[0] = (x + h).astype(o_ref.dtype)                        # identity shortcut

    return kernel


# ----------------------------------------------------------------------------
# Wrapper: one fused pallas_call for the whole block
# ----------------------------------------------------------------------------
def conditional_residual_block(x, y, params):
    """x: (N, C, H, W) float32 (NCHW), y: (N,) int class labels."""
    N, C, H, W = x.shape
    HW = H * W

    # Class-conditional scale/shift (nn.Embedding lookup) — tiny XLA gather, packed so the
    # kernel gets ONE (1, C, 6) block per sample: columns [g1, a1, b1, g2, a2, b2].
    e1 = params["embed1_w"][y].reshape(N, 3, C)
    e2 = params["embed2_w"][y].reshape(N, 3, C)
    emb = jnp.transpose(jnp.concatenate([e1, e2], axis=1), (0, 2, 1))        # (N, C, 6)

    def w2d(w):  # OIHW -> (Cout, 9*Cin); taps row-major (kh, kw), ci fastest (matches kernel)
        return jnp.transpose(w, (0, 2, 3, 1)).reshape(w.shape[0], 9 * w.shape[1])

    w1 = w2d(params["conv1_w"])
    w2 = w2d(params["conv2_w"])
    bias = jnp.stack([params["conv1_b"], params["conv2_b"]], axis=-1)        # (C, 2)

    kernel = _make_block_kernel(C, H, W)
    # TODO(synk): for production-size images (v7x 64 MiB VMEM) add spatial tiling with a
    # two-pass instance-norm (stats pass + apply pass); whole-image blocks are fine here.
    out = pl.pallas_call(
        kernel,
        out_shape=jax.ShapeDtypeStruct((N, C, HW), x.dtype),
        grid=(N,),
        in_specs=[
            pl.BlockSpec((1, C, HW), lambda n: (n, 0, 0)),     # activation (lane-dense)
            pl.BlockSpec((1, C, 6), lambda n: (n, 0, 0)),      # packed gamma/alpha/beta x2
            pl.BlockSpec((C, 9 * C), lambda n: (0, 0)),        # conv1 weights (im2col form)
            pl.BlockSpec((C, 9 * C), lambda n: (0, 0)),        # conv2 weights
            pl.BlockSpec((C, 2), lambda n: (0, 0)),            # packed conv biases
        ],
        out_specs=pl.BlockSpec((1, C, HW), lambda n: (n, 0, 0)),
        scratch_shapes=[
            pltpu.VMEM((C, HW + 2 * (W + 1)), jnp.float32),    # zero-halo padded image
            pltpu.VMEM((9 * C, HW), jnp.float32),              # im2col patches (K = 9C)
        ],
        compiler_params=pltpu.CompilerParams(dimension_semantics=("parallel",)),
    )(x.reshape(N, C, HW), emb, w1, w2, bias)
    return out.reshape(N, C, H, W)


# ----------------------------------------------------------------------------
# Pure-JAX reference (mirrors the PyTorch forward) for verification
# ----------------------------------------------------------------------------
def reference_block(x, y, params):
    N, C, H, W = x.shape

    def norm_plus(z, embed_w):
        emb = embed_w[y]
        gamma, alpha, beta = emb[:, :C], emb[:, C:2 * C], emb[:, 2 * C:]
        means = z.mean(axis=(2, 3))                                   # (N, C)
        m = means.mean(axis=-1, keepdims=True)
        v = means.var(axis=-1, keepdims=True, ddof=1)                 # torch .var(): unbiased
        means_n = (means - m) / jnp.sqrt(v + 1e-5)
        mu = z.mean(axis=(2, 3), keepdims=True)
        var = z.var(axis=(2, 3), keepdims=True)                       # biased
        h = (z - mu) / jnp.sqrt(var + 1e-5)
        h = h + means_n[:, :, None, None] * alpha[:, :, None, None]
        return gamma[:, :, None, None] * h + beta[:, :, None, None]

    def elu(z):
        return jnp.where(z > 0, z, jnp.exp(z) - 1.0)

    def conv(z, w, b):
        return jax.lax.conv_general_dilated(
            z, w, window_strides=(1, 1), padding=((1, 1), (1, 1)),
            dimension_numbers=("NCHW", "OIHW", "NCHW")) + b[None, :, None, None]

    h = elu(norm_plus(x, params["embed1_w"]))
    h = conv(h, params["conv1_w"], params["conv1_b"])
    h = elu(norm_plus(h, params["embed2_w"]))
    h = conv(h, params["conv2_w"], params["conv2_b"])
    return x + h


# ----------------------------------------------------------------------------
# main
# ----------------------------------------------------------------------------
if __name__ == "__main__":
    N, C, H, W = 2, 4, 16, 16
    num_classes = 10

    key = jax.random.PRNGKey(0)
    k = jax.random.split(key, 8)

    x = jax.random.normal(k[0], (N, C, H, W), dtype=jnp.float32)
    y = jax.random.randint(k[1], (N,), 0, num_classes)

    # Embedding weights (ConditionalInstanceNorm2dPlus init: first 2C ~ N(1, 0.02), last C = 0)
    def make_embed(kk):
        ga = 1.0 + 0.02 * jax.random.normal(kk, (num_classes, 2 * C), dtype=jnp.float32)
        return jnp.concatenate([ga, jnp.zeros((num_classes, C), jnp.float32)], axis=-1)

    params = {
        "embed1_w": make_embed(k[2]),
        "embed2_w": make_embed(k[3]),
        "conv1_w": 0.1 * jax.random.normal(k[4], (C, C, 3, 3), dtype=jnp.float32),  # OIHW
        "conv1_b": 0.05 * jax.random.normal(k[5], (C,), dtype=jnp.float32),
        "conv2_w": 0.1 * jax.random.normal(k[6], (C, C, 3, 3), dtype=jnp.float32),  # OIHW
        "conv2_b": 0.05 * jax.random.normal(k[7], (C,), dtype=jnp.float32),
    }

    out = jax.block_until_ready(conditional_residual_block(x, y, params))
    ref = jax.block_until_ready(reference_block(x, y, params))

    assert out.shape == (N, C, H, W)
    err = float(jnp.max(jnp.abs(out - ref)))
    assert jnp.allclose(out, ref, rtol=1e-4, atol=1e-4), err

    print("KERNEL_OK")
</pallas_src>

<mosaic_0001>
module attributes {stable_mosaic.version = 11 : i64} {
  func.func @kernel(%arg0: i32, %arg1: memref<1x4x256xf32, #tpu.memory_space<vmem>>, %arg2: memref<1x4x6xf32, #tpu.memory_space<vmem>>, %arg3: memref<4x36xf32, #tpu.memory_space<vmem>>, %arg4: memref<4x36xf32, #tpu.memory_space<vmem>>, %arg5: memref<4x2xf32, #tpu.memory_space<vmem>>, %arg6: memref<1x4x256xf32, #tpu.memory_space<vmem>>, %arg7: memref<4x290xf32, #tpu.memory_space<vmem>>, %arg8: memref<36x256xf32, #tpu.memory_space<vmem>>) attributes {dimension_semantics = [#tpu.dimension_semantics<parallel>], iteration_bounds = array<i64: 2>, scalar_prefetch = 0 : i64, scratch_operands = 2 : i64, tpu.core_type = #tpu.core_type<tc>, window_params = [{transform_indices = @transform_0, window_bounds = array<i64: 1, 4, 256>}, {transform_indices = @transform_1, window_bounds = array<i64: 1, 4, 6>}, {pipeline_mode = #tpu.pipeline_mode<synchronous>, transform_indices = @transform_2, window_bounds = array<i64: 4, 36>}, {pipeline_mode = #tpu.pipeline_mode<synchronous>, transform_indices = @transform_3, window_bounds = array<i64: 4, 36>}, {pipeline_mode = #tpu.pipeline_mode<synchronous>, transform_indices = @transform_4, window_bounds = array<i64: 4, 2>}, {transform_indices = @transform_5, window_bounds = array<i64: 1, 4, 256>}]} {
    %c0 = arith.constant 0 : index
    %c0_0 = arith.constant 0 : index
    %c0_1 = arith.constant 0 : index
    %0 = vector.load %arg1[%c0, %c0_0, %c0_1] : memref<1x4x256xf32, #tpu.memory_space<vmem>>, vector<1x4x256xf32>
    %1 = vector.shape_cast %0 : vector<1x4x256xf32> to vector<4x256xf32>
    %c0_2 = arith.constant 0 : index
    %c0_3 = arith.constant 0 : index
    %c0_4 = arith.constant 0 : index
    %2 = vector.load %arg2[%c0_2, %c0_3, %c0_4] : memref<1x4x6xf32, #tpu.memory_space<vmem>>, vector<1x4x6xf32>
    %3 = vector.shape_cast %2 : vector<1x4x6xf32> to vector<4x6xf32>
    %4 = tpu.iota {dimensions = array<i32: 1>} : vector<1x256xi32>
    %c16_i32 = arith.constant 16 : i32
    %c0_i32 = arith.constant 0 : i32
    %5 = arith.cmpi eq, %c16_i32, %c0_i32 : i32
    %c1_i32 = arith.constant 1 : i32
    %6 = arith.select %5, %c1_i32, %c16_i32 : i32
    %7 = vector.broadcast %6 : i32 to vector<1x256xi32>
    %8 = arith.remsi %4, %7 : vector<1x256xi32>
    %c0_i32_5 = arith.constant 0 : i32
    %9 = vector.broadcast %c0_i32_5 : i32 to vector<1x256xi32>
    %10 = arith.cmpi ne, %8, %9 : vector<1x256xi32>
    %c0_i32_6 = arith.constant 0 : i32
    %11 = vector.broadcast %c0_i32_6 : i32 to vector<1x256xi32>
    %12 = arith.cmpi slt, %8, %11 : vector<1x256xi32>
    %c0_i32_7 = arith.constant 0 : i32
    %13 = arith.cmpi slt, %6, %c0_i32_7 : i32
    %14 = vector.broadcast %13 : i1 to vector<1x256xi1>
    %15 = vector.broadcast %14 : vector<1x256xi1> to vector<1x256xi1>
    %16 = arith.xori %12, %15 : vector<1x256xi1>
    %17 = arith.andi %16, %10 : vector<1x256xi1>
    %18 = vector.broadcast %6 : i32 to vector<1x256xi32>
    %19 = arith.addi %8, %18 : vector<1x256xi32>
    %20 = arith.select %17, %19, %8 : vector<1x256xi1>, vector<1x256xi32>
    %cst = arith.constant 0.000000e+00 : f32
    %21 = vector.broadcast %cst : f32 to vector<4x290xf32>
    %c0_8 = arith.constant 0 : index
    %c0_9 = arith.constant 0 : index
    %22 = vector.load %arg7[%c0_8, %c0_9] : memref<4x290xf32, #tpu.memory_space<vmem>>, vector<4x290xf32>
    tpu.vector_store %arg7[%c0_8, %c0_9], %21 {strides = array<i32>} : memref<4x290xf32, #tpu.memory_space<vmem>>, vector<4x290xf32>,
    %23 = vector.extract_strided_slice %3 {offsets = [0, 0], sizes = [4, 1], strides = [1, 1]} : vector<4x6xf32> to vector<4x1xf32>
    %24 = vector.extract_strided_slice %3 {offsets = [0, 1], sizes = [4, 1], strides = [1, 1]} : vector<4x6xf32> to vector<4x1xf32>
    %25 = vector.extract_strided_slice %3 {offsets = [0, 2], sizes = [4, 1], strides = [1, 1]} : vector<4x6xf32> to vector<4x1xf32>
    %cst_10 = arith.constant dense<0.000000e+00> : vector<4xf32>
    %26 = vector.multi_reduction <add>, %1, %cst_10 [1] : vector<4x256xf32> to vector<4xf32>
    %27 = vector.shape_cast %26 : vector<4xf32> to vector<4x1xf32>
    %28 = arith.mulf %1, %1 : vector<4x256xf32>
    %cst_11 = arith.constant dense<0.000000e+00> : vector<4xf32>
    %29 = vector.multi_reduction <add>, %28, %cst_11 [1] : vector<4x256xf32> to vector<4xf32>
    %30 = vector.shape_cast %29 : vector<4xf32> to vector<4x1xf32>
    %cst_12 = arith.constant 3.906250e-03 : f32
    %31 = vector.broadcast %cst_12 : f32 to vector<4x1xf32>
    %32 = arith.mulf %27, %31 : vector<4x1xf32>
    %cst_13 = arith.constant 3.906250e-03 : f32
    %33 = vector.broadcast %cst_13 : f32 to vector<4x1xf32>
    %34 = arith.mulf %30, %33 : vector<4x1xf32>
    %35 = arith.mulf %32, %32 : vector<4x1xf32>
    %36 = arith.subf %34, %35 : vector<4x1xf32>
    %37 = vector.broadcast %32 : vector<4x1xf32> to vector<4x256xf32>
    %38 = arith.subf %1, %37 : vector<4x256xf32>
    %cst_14 = arith.constant 9.99999974E-6 : f32
    %39 = vector.broadcast %cst_14 : f32 to vector<4x1xf32>
    %40 = arith.addf %36, %39 : vector<4x1xf32>
    %41 = math.rsqrt %40 : vector<4x1xf32>
    %42 = vector.broadcast %41 : vector<4x1xf32> to vector<4x256xf32>
    %43 = arith.mulf %38, %42 : vector<4x256xf32>
    %cst_15 = arith.constant dense<0.000000e+00> : vector<1xf32>
    %44 = vector.multi_reduction <add>, %32, %cst_15 [0] : vector<4x1xf32> to vector<1xf32>
    %45 = vector.shape_cast %44 : vector<1xf32> to vector<1x1xf32>
    %cst_16 = arith.constant 4.000000e+00 : f32
    %46 = vector.broadcast %cst_16 : f32 to vector<1x1xf32>
    %47 = arith.divf %45, %46 : vector<1x1xf32>
    %48 = vector.broadcast %47 : vector<1x1xf32> to vector<4x1xf32>
    %49 = arith.subf %32, %48 : vector<4x1xf32>
    %50 = arith.mulf %49, %49 : vector<4x1xf32>
    %cst_17 = arith.constant dense<0.000000e+00> : vector<1xf32>
    %51 = vector.multi_reduction <add>, %50, %cst_17 [0] : vector<4x1xf32> to vector<1xf32>
    %52 = vector.shape_cast %51 : vector<1xf32> to vector<1x1xf32>
    %cst_18 = arith.constant 0.333333343 : f32
    %53 = vector.broadcast %cst_18 : f32 to vector<1x1xf32>
    %54 = arith.mulf %52, %53 : vector<1x1xf32>
    %cst_19 = arith.constant 9.99999974E-6 : f32
    %55 = vector.broadcast %cst_19 : f32 to vector<1x1xf32>
    %56 = arith.addf %54, %55 : vector<1x1xf32>
    %57 = math.rsqrt %56 : vector<1x1xf32>
    %58 = vector.broadcast %57 : vector<1x1xf32> to vector<4x1xf32>
    %59 = arith.mulf %49, %58 : vector<4x1xf32>
    %60 = arith.mulf %59, %24 : vector<4x1xf32>
    %61 = vector.broadcast %60 : vector<4x1xf32> to vector<4x256xf32>
    %62 = arith.addf %43, %61 : vector<4x256xf32>
    %63 = vector.broadcast %23 : vector<4x1xf32> to vector<4x256xf32>
    %64 = arith.mulf %63, %62 : vector<4x256xf32>
    %65 = vector.broadcast %25 : vector<4x1xf32> to vector<4x256xf32>
    %66 = arith.addf %64, %65 : vector<4x256xf32>
    %cst_20 = arith.constant 0.000000e+00 : f32
    %67 = vector.broadcast %cst_20 : f32 to vector<4x256xf32>
    %68 = arith.cmpf ogt, %66, %67 : vector<4x256xf32>
    %69 = math.exp %66 : vector<4x256xf32>
    %cst_21 = arith.constant 1.000000e+00 : f32
    %70 = vector.broadcast %cst_21 : f32 to vector<4x256xf32>
    %71 = arith.subf %69, %70 : vector<4x256xf32>
    %72 = arith.select %68, %66, %71 : vector<4x256xi1>, vector<4x256xf32>
    %c0_22 = arith.constant 0 : index
    %c0_23 = arith.constant 0 : index
    %73 = vector.load %arg5[%c0_22, %c0_23] : memref<4x2xf32, #tpu.memory_space<vmem>>, vector<4x1xf32>
    %c0_24 = arith.constant 0 : index
    %c17 = arith.constant 17 : index
    %74 = vector.load %arg7[%c0_24, %c17] : memref<4x290xf32, #tpu.memory_space<vmem>>, vector<4x256xf32>
    tpu.vector_store %arg7[%c0_24, %c17], %72 {strides = array<i32>} : memref<4x290xf32, #tpu.memory_space<vmem>>, vector<4x256xf32>,
    %c0_25 = arith.constant 0 : index
    %c0_26 = arith.constant 0 : index
    %75 = vector.load %arg7[%c0_25, %c0_26] : memref<4x290xf32, #tpu.memory_space<vmem>>, vector<4x256xf32>
    %c0_i32_27 = arith.constant 0 : i32
    %76 = vector.broadcast %c0_i32_27 : i32 to vector<1x256xi32>
    %77 = arith.cmpi eq, %20, %76 : vector<1x256xi32>
    %cst_28 = arith.constant 0.000000e+00 : f32
    %78 = vector.shape_cast %77 : vector<1x256xi1> to vector<1x256xi1>
    %79 = vector.broadcast %78 : vector<1x256xi1> to vector<4x256xi1>
    %80 = vector.broadcast %cst_28 : f32 to vector<4x256xf32>
    %81 = arith.select %79, %80, %75 : vector<4x256xi1>, vector<4x256xf32>
    %c0_29 = arith.constant 0 : index
    %c0_30 = arith.constant 0 : index
    %82 = vector.load %arg8[%c0_29, %c0_30] : memref<36x256xf32, #tpu.memory_space<vmem>>, vector<4x256xf32>
    tpu.vector_store %arg8[%c0_29, %c0_30], %81 {strides = array<i32>} : memref<36x256xf32, #tpu.memory_space<vmem>>, vector<4x256xf32>,
    %c0_31 = arith.constant 0 : index
    %c1 = arith.constant 1 : index
    %83 = vector.load %arg7[%c0_31, %c1] : memref<4x290xf32, #tpu.memory_space<vmem>>, vector<4x256xf32>
    %c4 = arith.constant 4 : index
    %c0_32 = arith.constant 0 : index
    %84 = vector.load %arg8[%c4, %c0_32] : memref<36x256xf32, #tpu.memory_space<vmem>>, vector<4x256xf32>
    tpu.vector_store %arg8[%c4, %c0_32], %83 {strides = array<i32>} : memref<36x256xf32, #tpu.memory_space<vmem>>, vector<4x256xf32>,
    %c0_33 = arith.constant 0 : index
    %c2 = arith.constant 2 : index
    %85 = vector.load %arg7[%c0_33, %c2] : memref<4x290xf32, #tpu.memory_space<vmem>>, vector<4x256xf32>
    %c15_i32 = arith.constant 15 : i32
    %86 = vector.broadcast %c15_i32 : i32 to vector<1x256xi32>
    %87 = arith.cmpi eq, %20, %86 : vector<1x256xi32>
    %cst_34 = arith.constant 0.000000e+00 : f32
    %88 = vector.shape_cast %87 : vector<1x256xi1> to vector<1x256xi1>
    %89 = vector.broadcast %88 : vector<1x256xi1> to vector<4x256xi1>
    %90 = vector.broadcast %cst_34 : f32 to vector<4x256xf32>
    %91 = arith.select %89, %90, %85 : vector<4x256xi1>, vector<4x256xf32>
    %c8 = arith.constant 8 : index
    %c0_35 = arith.constant 0 : index
    %92 = vector.load %arg8[%c8, %c0_35] : memref<36x256xf32, #tpu.memory_space<vmem>>, vector<4x256xf32>
    tpu.vector_store %arg8[%c8, %c0_35], %91 {strides = array<i32>} : memref<36x256xf32, #tpu.memory_space<vmem>>, vector<4x256xf32>,
    %c0_36 = arith.constant 0 : index
    %c16 = arith.constant 16 : index
    %93 = vector.load %arg7[%c0_36, %c16] : memref<4x290xf32, #tpu.memory_space<vmem>>, vector<4x256xf32>
    %c0_i32_37 = arith.constant 0 : i32
    %94 = vector.broadcast %c0_i32_37 : i32 to vector<1x256xi32>
    %95 = arith.cmpi eq, %20, %94 : vector<1x256xi32>
    %cst_38 = arith.constant 0.000000e+00 : f32
    %96 = vector.shape_cast %95 : vector<1x256xi1> to vector<1x256xi1>
    %97 = vector.broadcast %96 : vector<1x256xi1> to vector<4x256xi1>
    %98 = vector.broadcast %cst_38 : f32 to vector<4x256xf32>
    %99 = arith.select %97, %98, %93 : vector<4x256xi1>, vector<4x256xf32>
    %c12 = arith.constant 12 : index
    %c0_39 = arith.constant 0 : index
    %100 = vector.load %arg8[%c12, %c0_39] : memref<36x256xf32, #tpu.memory_space<vmem>>, vector<4x256xf32>
    tpu.vector_store %arg8[%c12, %c0_39], %99 {strides = array<i32>} : memref<36x256xf32, #tpu.memory_space<vmem>>, vector<4x256xf32>,
    %c0_40 = arith.constant 0 : index
    %c17_41 = arith.constant 17 : index
    %101 = vector.load %arg7[%c0_40, %c17_41] : memref<4x290xf32, #tpu.memory_space<vmem>>, vector<4x256xf32>
    %c16_42 = arith.constant 16 : index
    %c0_43 = arith.constant 0 : index
    %102 = vector.load %arg8[%c16_42, %c0_43] : memref<36x256xf32, #tpu.memory_space<vmem>>, vector<4x256xf32>
    tpu.vector_store %arg8[%c16_42, %c0_43], %101 {strides = array<i32>} : memref<36x256xf32, #tpu.memory_space<vmem>>, vector<4x256xf32>,
    %c0_44 = arith.constant 0 : index
    %c18 = arith.constant 18 : index
    %103 = vector.load %arg7[%c0_44, %c18] : memref<4x290xf32, #tpu.memory_space<vmem>>, vector<4x256xf32>
    %c15_i32_45 = arith.constant 15 : i32
    %104 = vector.broadcast %c15_i32_45 : i32 to vector<1x256xi32>
    %105 = arith.cmpi eq, %20, %104 : vector<1x256xi32>
    %cst_46 = arith.constant 0.000000e+00 : f32
    %106 = vector.shape_cast %105 : vector<1x256xi1> to vector<1x256xi1>
    %107 = vector.broadcast %106 : vector<1x256xi1> to vector<4x256xi1>
    %108 = vector.broadcast %cst_46 : f32 to vector<4x256xf32>
    %109 = arith.select %107, %108, %103 : vector<4x256xi1>, vector<4x256xf32>
    %c20 = arith.constant 20 : index
    %c0_47 = arith.constant 0 : index
    %110 = vector.load %arg8[%c20, %c0_47] : memref<36x256xf32, #tpu.memory_space<vmem>>, vector<4x256xf32>
    tpu.vector_store %arg8[%c20, %c0_47], %109 {strides = array<i32>} : memref<36x256xf32, #tpu.memory_space<vmem>>, vector<4x256xf32>,
    %c0_48 = arith.constant 0 : index
    %c32 = arith.constant 32 : index
    %111 = vector.load %arg7[%c0_48, %c32] : memref<4x290xf32, #tpu.memory_space<vmem>>, vector<4x256xf32>
    %c0_i32_49 = arith.constant 0 : i32
    %112 = vector.broadcast %c0_i32_49 : i32 to vector<1x256xi32>
    %113 = arith.cmpi eq, %20, %112 : vector<1x256xi32>
    %cst_50 = arith.constant 0.000000e+00 : f32
    %114 = vector.shape_cast %113 : vector<1x256xi1> to vector<1x256xi1>
    %115 = vector.broadcast %114 : vector<1x256xi1> to vector<4x256xi1>
    %116 = vector.broadcast %cst_50 : f32 to vector<4x256xf32>
    %117 = arith.select %115, %116, %111 : vector<4x256xi1>, vector<4x256xf32>
    %c24 = arith.constant 24 : index
    %c0_51 = arith.constant 0 : index
    %118 = vector.load %arg8[%c24, %c0_51] : memref<36x256xf32, #tpu.memory_space<vmem>>, vector<4x256xf32>
    tpu.vector_store %arg8[%c24, %c0_51], %117 {strides = array<i32>} : memref<36x256xf32, #tpu.memory_space<vmem>>, vector<4x256xf32>,
    %c0_52 = arith.constant 0 : index
    %c33 = arith.constant 33 : index
    %119 = vector.load %arg7[%c0_52, %c33] : memref<4x290xf32, #tpu.memory_space<vmem>>, vector<4x256xf32>
    %c28 = arith.constant 28 : index
    %c0_53 = arith.constant 0 : index
    %120 = vector.load %arg8[%c28, %c0_53] : memref<36x256xf32, #tpu.memory_space<vmem>>, vector<4x256xf32>
    tpu.vector_store %arg8[%c28, %c0_53], %119 {strides = array<i32>} : memref<36x256xf32, #tpu.memory_space<vmem>>, vector<4x256xf32>,
    %c0_54 = arith.constant 0 : index
    %c34 = arith.constant 34 : index
    %121 = vector.load %arg7[%c0_54, %c34] : memref<4x290xf32, #tpu.memory_space<vmem>>, vector<4x256xf32>
    %c15_i32_55 = arith.constant 15 : i32
    %122 = vector.broadcast %c15_i32_55 : i32 to vector<1x256xi32>
    %123 = arith.cmpi eq, %20, %122 : vector<1x256xi32>
    %cst_56 = arith.constant 0.000000e+00 : f32
    %124 = vector.shape_cast %123 : vector<1x256xi1> to vector<1x256xi1>
    %125 = vector.broadcast %124 : vector<1x256xi1> to vector<4x256xi1>
    %126 = vector.broadcast %cst_56 : f32 to vector<4x256xf32>
    %127 = arith.select %125, %126, %121 : vector<4x256xi1>, vector<4x256xf32>
    %c32_57 = arith.constant 32 : index
    %c0_58 = arith.constant 0 : index
    %128 = vector.load %arg8[%c32_57, %c0_58] : memref<36x256xf32, #tpu.memory_space<vmem>>, vector<4x256xf32>
    tpu.vector_store %arg8[%c32_57, %c0_58], %127 {strides = array<i32>} : memref<36x256xf32, #tpu.memory_space<vmem>>, vector<4x256xf32>,
    %c0_59 = arith.constant 0 : index
    %c0_60 = arith.constant 0 : index
    %129 = vector.load %arg3[%c0_59, %c0_60] : memref<4x36xf32, #tpu.memory_space<vmem>>, vector<4x36xf32>
    %c0_61 = arith.constant 0 : index
    %c0_62 = arith.constant 0 : index
    %130 = vector.load %arg8[%c0_61, %c0_62] : memref<36x256xf32, #tpu.memory_space<vmem>>, vector<36x256xf32>
    %cst_63 = arith.constant dense<0.000000e+00> : vector<4x256xf32>
    %131 = tpu.matmul %129, %130, %cst_63 {dimension_numbers = #tpu.dot_dimension_numbers<[1], [0], [0], [1], [0, 0, 1, 1], [], []>} : vector<4x36xf32>, vector<36x256xf32>, vector<4x256xf32> -> vector<4x256xf32>
    %132 = vector.broadcast %73 : vector<4x1xf32> to vector<4x256xf32>
    %133 = arith.addf %131, %132 : vector<4x256xf32>
    %134 = vector.extract_strided_slice %3 {offsets = [0, 3], sizes = [4, 1], strides = [1, 1]} : vector<4x6xf32> to vector<4x1xf32>
    %135 = vector.extract_strided_slice %3 {offsets = [0, 4], sizes = [4, 1], strides = [1, 1]} : vector<4x6xf32> to vector<4x1xf32>
    %136 = vector.extract_strided_slice %3 {offsets = [0, 5], sizes = [4, 1], strides = [1, 1]} : vector<4x6xf32> to vector<4x1xf32>
    %cst_64 = arith.constant dense<0.000000e+00> : vector<4xf32>
    %137 = vector.multi_reduction <add>, %133, %cst_64 [1] : vector<4x256xf32> to vector<4xf32>
    %138 = vector.shape_cast %137 : vector<4xf32> to vector<4x1xf32>
    %139 = arith.mulf %133, %133 : vector<4x256xf32>
    %cst_65 = arith.constant dense<0.000000e+00> : vector<4xf32>
    %140 = vector.multi_reduction <add>, %139, %cst_65 [1] : vector<4x256xf32> to vector<4xf32>
    %141 = vector.shape_cast %140 : vector<4xf32> to vector<4x1xf32>
    %cst_66 = arith.constant 3.906250e-03 : f32
    %142 = vector.broadcast %cst_66 : f32 to vector<4x1xf32>
    %143 = arith.mulf %138, %142 : vector<4x1xf32>
    %cst_67 = arith.constant 3.906250e-03 : f32
    %144 = vector.broadcast %cst_67 : f32 to vector<4x1xf32>
    %145 = arith.mulf %141, %144 : vector<4x1xf32>
    %146 = arith.mulf %143, %143 : vector<4x1xf32>
    %147 = arith.subf %145, %146 : vector<4x1xf32>
    %148 = vector.broadcast %143 : vector<4x1xf32> to vector<4x256xf32>
    %149 = arith.subf %133, %148 : vector<4x256xf32>
    %cst_68 = arith.constant 9.99999974E-6 : f32
    %150 = vector.broadcast %cst_68 : f32 to vector<4x1xf32>
    %151 = arith.addf %147, %150 : vector<4x1xf32>
    %152 = math.rsqrt %151 : vector<4x1xf32>
    %153 = vector.broadcast %152 : vector<4x1xf32> to vector<4x256xf32>
    %154 = arith.mulf %149, %153 : vector<4x256xf32>
    %cst_69 = arith.constant dense<0.000000e+00> : vector<1xf32>
    %155 = vector.multi_reduction <add>, %143, %cst_69 [0] : vector<4x1xf32> to vector<1xf32>
    %156 = vector.shape_cast %155 : vector<1xf32> to vector<1x1xf32>
    %cst_70 = arith.constant 4.000000e+00 : f32
    %157 = vector.broadcast %cst_70 : f32 to vector<1x1xf32>
    %158 = arith.divf %156, %157 : vector<1x1xf32>
    %159 = vector.broadcast %158 : vector<1x1xf32> to vector<4x1xf32>
    %160 = arith.subf %143, %159 : vector<4x1xf32>
    %161 = arith.mulf %160, %160 : vector<4x1xf32>
    %cst_71 = arith.constant dense<0.000000e+00> : vector<1xf32>
    %162 = vector.multi_reduction <add>, %161, %cst_71 [0] : vector<4x1xf32> to vector<1xf32>
    %163 = vector.shape_cast %162 : vector<1xf32> to vector<1x1xf32>
    %cst_72 = arith.constant 0.333333343 : f32
    %164 = vector.broadcast %cst_72 : f32 to vector<1x1xf32>
    %165 = arith.mulf %163, %164 : vector<1x1xf32>
    %cst_73 = arith.constant 9.99999974E-6 : f32
    %166 = vector.broadcast %cst_73 : f32 to vector<1x1xf32>
    %167 = arith.addf %165, %166 : vector<1x1xf32>
    %168 = math.rsqrt %167 : vector<1x1xf32>
    %169 = vector.broadcast %168 : vector<1x1xf32> to vector<4x1xf32>
    %170 = arith.mulf %160, %169 : vector<4x1xf32>
    %171 = arith.mulf %170, %135 : vector<4x1xf32>
    %172 = vector.broadcast %171 : vector<4x1xf32> to vector<4x256xf32>
    %173 = arith.addf %154, %172 : vector<4x256xf32>
    %174 = vector.broadcast %134 : vector<4x1xf32> to vector<4x256xf32>
    %175 = arith.mulf %174, %173 : vector<4x256xf32>
    %176 = vector.broadcast %136 : vector<4x1xf32> to vector<4x256xf32>
    %177 = arith.addf %175, %176 : vector<4x256xf32>
    %cst_74 = arith.constant 0.000000e+00 : f32
    %178 = vector.broadcast %cst_74 : f32 to vector<4x256xf32>
    %179 = arith.cmpf ogt, %177, %178 : vector<4x256xf32>
    %180 = math.exp %177 : vector<4x256xf32>
    %cst_75 = arith.constant 1.000000e+00 : f32
    %181 = vector.broadcast %cst_75 : f32 to vector<4x256xf32>
    %182 = arith.subf %180, %181 : vector<4x256xf32>
    %183 = arith.select %179, %177, %182 : vector<4x256xi1>, vector<4x256xf32>
    %c0_76 = arith.constant 0 : index
    %c1_77 = arith.constant 1 : index
    %184 = vector.load %arg5[%c0_76, %c1_77] : memref<4x2xf32, #tpu.memory_space<vmem>>, vector<4x1xf32>
    %c0_78 = arith.constant 0 : index
    %c17_79 = arith.constant 17 : index
    %185 = vector.load %arg7[%c0_78, %c17_79] : memref<4x290xf32, #tpu.memory_space<vmem>>, vector<4x256xf32>
    tpu.vector_store %arg7[%c0_78, %c17_79], %183 {strides = array<i32>} : memref<4x290xf32, #tpu.memory_space<vmem>>, vector<4x256xf32>,
    %c0_80 = arith.constant 0 : index
    %c0_81 = arith.constant 0 : index
    %186 = vector.load %arg7[%c0_80, %c0_81] : memref<4x290xf32, #tpu.memory_space<vmem>>, vector<4x256xf32>
    %c0_i32_82 = arith.constant 0 : i32
    %187 = vector.broadcast %c0_i32_82 : i32 to vector<1x256xi32>
    %188 = arith.cmpi eq, %20, %187 : vector<1x256xi32>
    %cst_83 = arith.constant 0.000000e+00 : f32
    %189 = vector.shape_cast %188 : vector<1x256xi1> to vector<1x256xi1>
    %190 = vector.broadcast %189 : vector<1x256xi1> to vector<4x256xi1>
    %191 = vector.broadcast %cst_83 : f32 to vector<4x256xf32>
    %192 = arith.select %190, %191, %186 : vector<4x256xi1>, vector<4x256xf32>
    %c0_84 = arith.constant 0 : index
    %c0_85 = arith.constant 0 : index
    %193 = vector.load %arg8[%c0_84, %c0_85] : memref<36x256xf32, #tpu.memory_space<vmem>>, vector<4x256xf32>
    tpu.vector_store %arg8[%c0_84, %c0_85], %192 {strides = array<i32>} : memref<36x256xf32, #tpu.memory_space<vmem>>, vector<4x256xf32>,
    %c0_86 = arith.constant 0 : index
    %c1_87 = arith.constant 1 : index
    %194 = vector.load %arg7[%c0_86, %c1_87] : memref<4x290xf32, #tpu.memory_space<vmem>>, vector<4x256xf32>
    %c4_88 = arith.constant 4 : index
    %c0_89 = arith.constant 0 : index
    %195 = vector.load %arg8[%c4_88, %c0_89] : memref<36x256xf32, #tpu.memory_space<vmem>>, vector<4x256xf32>
    tpu.vector_store %arg8[%c4_88, %c0_89], %194 {strides = array<i32>} : memref<36x256xf32, #tpu.memory_space<vmem>>, vector<4x256xf32>,
    %c0_90 = arith.constant 0 : index
    %c2_91 = arith.constant 2 : index
    %196 = vector.load %arg7[%c0_90, %c2_91] : memref<4x290xf32, #tpu.memory_space<vmem>>, vector<4x256xf32>
    %c15_i32_92 = arith.constant 15 : i32
    %197 = vector.broadcast %c15_i32_92 : i32 to vector<1x256xi32>
    %198 = arith.cmpi eq, %20, %197 : vector<1x256xi32>
    %cst_93 = arith.constant 0.000000e+00 : f32
    %199 = vector.shape_cast %198 : vector<1x256xi1> to vector<1x256xi1>
    %200 = vector.broadcast %199 : vector<1x256xi1> to vector<4x256xi1>
    %201 = vector.broadcast %cst_93 : f32 to vector<4x256xf32>
    %202 = arith.select %200, %201, %196 : vector<4x256xi1>, vector<4x256xf32>
    %c8_94 = arith.constant 8 : index
    %c0_95 = arith.constant 0 : index
    %203 = vector.load %arg8[%c8_94, %c0_95] : memref<36x256xf32, #tpu.memory_space<vmem>>, vector<4x256xf32>
    tpu.vector_store %arg8[%c8_94, %c0_95], %202 {strides = array<i32>} : memref<36x256xf32, #tpu.memory_space<vmem>>, vector<4x256xf32>,
    %c0_96 = arith.constant 0 : index
    %c16_97 = arith.constant 16 : index
    %204 = vector.load %arg7[%c0_96, %c16_97] : memref<4x290xf32, #tpu.memory_space<vmem>>, vector<4x256xf32>
    %c0_i32_98 = arith.constant 0 : i32
    %205 = vector.broadcast %c0_i32_98 : i32 to vector<1x256xi32>
    %206 = arith.cmpi eq, %20, %205 : vector<1x256xi32>
    %cst_99 = arith.constant 0.000000e+00 : f32
    %207 = vector.shape_cast %206 : vector<1x256xi1> to vector<1x256xi1>
    %208 = vector.broadcast %207 : vector<1x256xi1> to vector<4x256xi1>
    %209 = vector.broadcast %cst_99 : f32 to vector<4x256xf32>
    %210 = arith.select %208, %209, %204 : vector<4x256xi1>, vector<4x256xf32>
    %c12_100 = arith.constant 12 : index
    %c0_101 = arith.constant 0 : index
    %211 = vector.load %arg8[%c12_100, %c0_101] : memref<36x256xf32, #tpu.memory_space<vmem>>, vector<4x256xf32>
    tpu.vector_store %arg8[%c12_100, %c0_101], %210 {strides = array<i32>} : memref<36x256xf32, #tpu.memory_space<vmem>>, vector<4x256xf32>,
    %c0_102 = arith.constant 0 : index
    %c17_103 = arith.constant 17 : index
    %212 = vector.load %arg7[%c0_102, %c17_103] : memref<4x290xf32, #tpu.memory_space<vmem>>, vector<4x256xf32>
    %c16_104 = arith.constant 16 : index
    %c0_105 = arith.constant 0 : index
    %213 = vector.load %arg8[%c16_104, %c0_105] : memref<36x256xf32, #tpu.memory_space<vmem>>, vector<4x256xf32>
    tpu.vector_store %arg8[%c16_104, %c0_105], %212 {strides = array<i32>} : memref<36x256xf32, #tpu.memory_space<vmem>>, vector<4x256xf32>,
    %c0_106 = arith.constant 0 : index
    %c18_107 = arith.constant 18 : index
    %214 = vector.load %arg7[%c0_106, %c18_107] : memref<4x290xf32, #tpu.memory_space<vmem>>, vector<4x256xf32>
    %c15_i32_108 = arith.constant 15 : i32
    %215 = vector.broadcast %c15_i32_108 : i32 to vector<1x256xi32>
    %216 = arith.cmpi eq, %20, %215 : vector<1x256xi32>
    %cst_109 = arith.constant 0.000000e+00 : f32
    %217 = vector.shape_cast %216 : vector<1x256xi1> to vector<1x256xi1>
    %218 = vector.broadcast %217 : vector<1x256xi1> to vector<4x256xi1>
    %219 = vector.broadcast %cst_109 : f32 to vector<4x256xf32>
    %220 = arith.select %218, %219, %214 : vector<4x256xi1>, vector<4x256xf32>
    %c20_110 = arith.constant 20 : index
    %c0_111 = arith.constant 0 : index
    %221 = vector.load %arg8[%c20_110, %c0_111] : memref<36x256xf32, #tpu.memory_space<vmem>>, vector<4x256xf32>
    tpu.vector_store %arg8[%c20_110, %c0_111], %220 {strides = array<i32>} : memref<36x256xf32, #tpu.memory_space<vmem>>, vector<4x256xf32>,
    %c0_112 = arith.constant 0 : index
    %c32_113 = arith.constant 32 : index
    %222 = vector.load %arg7[%c0_112, %c32_113] : memref<4x290xf32, #tpu.memory_space<vmem>>, vector<4x256xf32>
    %c0_i32_114 = arith.constant 0 : i32
    %223 = vector.broadcast %c0_i32_114 : i32 to vector<1x256xi32>
    %224 = arith.cmpi eq, %20, %223 : vector<1x256xi32>
    %cst_115 = arith.constant 0.000000e+00 : f32
    %225 = vector.shape_cast %224 : vector<1x256xi1> to vector<1x256xi1>
    %226 = vector.broadcast %225 : vector<1x256xi1> to vector<4x256xi1>
    %227 = vector.broadcast %cst_115 : f32 to vector<4x256xf32>
    %228 = arith.select %226, %227, %222 : vector<4x256xi1>, vector<4x256xf32>
    %c24_116 = arith.constant 24 : index
    %c0_117 = arith.constant 0 : index
    %229 = vector.load %arg8[%c24_116, %c0_117] : memref<36x256xf32, #tpu.memory_space<vmem>>, vector<4x256xf32>
    tpu.vector_store %arg8[%c24_116, %c0_117], %228 {strides = array<i32>} : memref<36x256xf32, #tpu.memory_space<vmem>>, vector<4x256xf32>,
    %c0_118 = arith.constant 0 : index
    %c33_119 = arith.constant 33 : index
    %230 = vector.load %arg7[%c0_118, %c33_119] : memref<4x290xf32, #tpu.memory_space<vmem>>, vector<4x256xf32>
    %c28_120 = arith.constant 28 : index
    %c0_121 = arith.constant 0 : index
    %231 = vector.load %arg8[%c28_120, %c0_121] : memref<36x256xf32, #tpu.memory_space<vmem>>, vector<4x256xf32>
    tpu.vector_store %arg8[%c28_120, %c0_121], %230 {strides = array<i32>} : memref<36x256xf32, #tpu.memory_space<vmem>>, vector<4x256xf32>,
    %c0_122 = arith.constant 0 : index
    %c34_123 = arith.constant 34 : index
    %232 = vector.load %arg7[%c0_122, %c34_123] : memref<4x290xf32, #tpu.memory_space<vmem>>, vector<4x256xf32>
    %c15_i32_124 = arith.constant 15 : i32
    %233 = vector.broadcast %c15_i32_124 : i32 to vector<1x256xi32>
    %234 = arith.cmpi eq, %20, %233 : vector<1x256xi32>
    %cst_125 = arith.constant 0.000000e+00 : f32
    %235 = vector.shape_cast %234 : vector<1x256xi1> to vector<1x256xi1>
    %236 = vector.broadcast %235 : vector<1x256xi1> to vector<4x256xi1>
    %237 = vector.broadcast %cst_125 : f32 to vector<4x256xf32>
    %238 = arith.select %236, %237, %232 : vector<4x256xi1>, vector<4x256xf32>
    %c32_126 = arith.constant 32 : index
    %c0_127 = arith.constant 0 : index
    %239 = vector.load %arg8[%c32_126, %c0_127] : memref<36x256xf32, #tpu.memory_space<vmem>>, vector<4x256xf32>
    tpu.vector_store %arg8[%c32_126, %c0_127], %238 {strides = array<i32>} : memref<36x256xf32, #tpu.memory_space<vmem>>, vector<4x256xf32>,
    %c0_128 = arith.constant 0 : index
    %c0_129 = arith.constant 0 : index
    %240 = vector.load %arg4[%c0_128, %c0_129] : memref<4x36xf32, #tpu.memory_space<vmem>>, vector<4x36xf32>
    %c0_130 = arith.constant 0 : index
    %c0_131 = arith.constant 0 : index
    %241 = vector.load %arg8[%c0_130, %c0_131] : memref<36x256xf32, #tpu.memory_space<vmem>>, vector<36x256xf32>
    %cst_132 = arith.constant dense<0.000000e+00> : vector<4x256xf32>
    %242 = tpu.matmul %240, %241, %cst_132 {dimension_numbers = #tpu.dot_dimension_numbers<[1], [0], [0], [1], [0, 0, 1, 1], [], []>} : vector<4x36xf32>, vector<36x256xf32>, vector<4x256xf32> -> vector<4x256xf32>
    %243 = vector.broadcast %184 : vector<4x1xf32> to vector<4x256xf32>
    %244 = arith.addf %242, %243 : vector<4x256xf32>
    %245 = arith.addf %1, %244 : vector<4x256xf32>
    %c0_133 = arith.constant 0 : index
    %c0_134 = arith.constant 0 : index
    %c0_135 = arith.constant 0 : index
    %246 = vector.load %arg6[%c0_133, %c0_134, %c0_135] : memref<1x4x256xf32, #tpu.memory_space<vmem>>, vector<1x4x256xf32>
    %247 = vector.shape_cast %246 : vector<1x4x256xf32> to vector<4x256xf32>
    %248 = vector.shape_cast %245 : vector<4x256xf32> to vector<1x4x256xf32>
    tpu.vector_store %arg6[%c0_133, %c0_134, %c0_135], %248 {strides = array<i32>} : memref<1x4x256xf32, #tpu.memory_space<vmem>>, vector<1x4x256xf32>,
    return
  }
  func.func @transform_0(%arg0: i32) -> (i32, i32, i32) {
    %c0_i32 = arith.constant 0 : i32
    %c0_i32_0 = arith.constant 0 : i32
    %c0_i32_1 = arith.constant 0 : i32
    return %arg0, %c0_i32, %c0_i32_0 : i32, i32, i32
  }
  func.func @transform_1(%arg0: i32) -> (i32, i32, i32) {
    %c0_i32 = arith.constant 0 : i32
    %c0_i32_0 = arith.constant 0 : i32
    %c0_i32_1 = arith.constant 0 : i32
    return %arg0, %c0_i32, %c0_i32_0 : i32, i32, i32
  }
  func.func @transform_2(%arg0: i32) -> (i32, i32) {
    %c0_i32 = arith.constant 0 : i32
    %c0_i32_0 = arith.constant 0 : i32
    %c0_i32_1 = arith.constant 0 : i32
    return %c0_i32, %c0_i32_0 : i32, i32
  }
  func.func @transform_3(%arg0: i32) -> (i32, i32) {
    %c0_i32 = arith.constant 0 : i32
    %c0_i32_0 = arith.constant 0 : i32
    %c0_i32_1 = arith.constant 0 : i32
    return %c0_i32, %c0_i32_0 : i32, i32
  }
  func.func @transform_4(%arg0: i32) -> (i32, i32) {
    %c0_i32 = arith.constant 0 : i32
    %c0_i32_0 = arith.constant 0 : i32
    %c0_i32_1 = arith.constant 0 : i32
    return %c0_i32, %c0_i32_0 : i32, i32
  }
  func.func @transform_5(%arg0: i32) -> (i32, i32, i32) {
    %c0_i32 = arith.constant 0 : i32
    %c0_i32_0 = arith.constant 0 : i32
    %c0_i32_1 = arith.constant 0 : i32
    return %arg0, %c0_i32, %c0_i32_0 : i32, i32, i32
  }
}

</mosaic_0001>

<bundles_post_ra>
// kernel: tpu_custom_call.1
= control target key start
LH: loop header
LB: loop body
LE: loop exit
PB: predicated region body
PF: predicated region fallthrough
CT: control target
= control target key end

     0   :  { %10 = vsyncpa [#allocation5], 0  ;;  %s1922_s0 = inlined_call_operand.hbm [shape: f32[2,4,256], index: 0, kind: input, shape index: {}]   ;;  %s1923_s1 = inlined_call_operand.hbm [shape: f32[2,4,6], index: 1, kind: input, shape index: {}]   ;;  %s1924_s2 = inlined_call_operand.vmem [shape: f32[4,36], index: 2, kind: input, shape index: {}]   ;;  %s1925_s3 = inlined_call_operand.vmem [shape: f32[4,36], index: 3, kind: input, shape index: {}]   ;;  %s1926_s4 = inlined_call_operand.vmem [shape: f32[4,2], index: 4, kind: input, shape index: {}]   ;;  %s1927_s5 = inlined_call_operand.hbm [shape: f32[2,4,256], index: 5, kind: output, shape index: {}]  }
   0x1   :  { %12 = vsyncpa [#allocation5 + $0x1], 0 }
   0x2   :  { %13 = vsyncpa [#allocation8], 0 }
   0x3   :  { %15 = vsyncpa [#allocation8 + $0x1], 0 }
   0x4   :  { %16 = vsyncpa [#allocation6], 0 }
   0x5   :  { %18 = vsyncpa [#allocation6 + $0x1], 0  ;;  %s1487_s18 = smov 0   ;;  %s1489_s19 = smov 0  }
   0x6   :  { %s1491_s20 = smov 0   ;;  %s1493_s21 = smov 0  }
   0x7 LB: > { %s1508_s22 = sadd.s32 4294967295, %s1435_s21   ;;  %s1181_s23 = sadd.s32 4294967294, %s1435_s21   ;;  %s1435_s21 = sphi %s1493_s21, %s1964_s21   ;;  %s1431_s20 = sphi %s1491_s20, %s1963_s20   ;;  %s1427_s19 = sphi %s1489_s19, %s1962_s19   ;;  %s1423_s18 = sphi %s1487_s18, %s1961_s18  }
   0x8   : > { %s1512_s24 = sadd.s32 1, %s1435_s21   ;;  %s31_s25 = sadd.s32 1, %s1431_s20 }
   0x9   : > { %s28_s26 = ssub.s32 %s1435_s21, %s1512_s24  ;;  %p38_p0 = scmp.ne.s32.totalorder %s1431_s20, %s1427_s19 }
   0xa   : > { %p29_p1 = scmp.eq.s32.totalorder %s28_s26, 0  ;;  %p39_p2 = scmp.eq.s32.totalorder %s1435_s21, 0 }
   0xb   : > { %p44_p3 = scmp.ne.s32.totalorder %s1427_s19, %s1423_s18  ;;  %p45_p4 = scmp.eq.s32.totalorder %s1508_s22, 0 }
   0xc   : > { %s1524_s27 = scalar_select %p29_p1, %s1431_s20, %s31_s25  }
   0xd   : > { %p1526_p5 = por %p39_p2, %p38_p0  ;;  %p1530_p6 = por %p45_p4, %p44_p3 }
   0xe   : > { %p157_p7 = scmp.eq.s32.totalorder %s1508_s22, 1  ;;  %p163_p8 = scmp.eq.s32.totalorder %s1181_s23, 1 }
   0xf   : > { %s1934_s29 = scalar_select %p1530_p6, 1, 0 }
  0x10   : > { %p1227_p10 = scmp.lt.s32.totalorder %s1435_s21, 2  ;;  %p1537_p11 = por %p157_p7, %p38_p0 }
  0x11   : > { %p1541_p12 = por %p163_p8, %p44_p3  ;;  %s1546_s7 = sand.u32 1, %s1431_s20  }
  0x12   : > { %s1935_s30 = scalar_select %p1537_p11, 1, 0 }
  0x13   : > { %s1936_s6 = scalar_select %p1541_p12, 1, 0 }
  0x14   : > { %s1208_s8 = sshll.u32 %s1435_s21, 7  ;;  %s1184_s9 = sshll.u32 %s1546_s7, 3 }
  0x15   : > { %s1553_s12 = scalar_lea.hbm %s1922_s0, %s1208_s8  ;;  %s196_s13 = scalar_lea.vmem [#allocation4], %s1184_s9 }
  0x16   : > { %s204_s14 = sshll.u32 %s196_s13, 4  ;;  %p1557_p13 = pnand %p1227_p10, %p1526_p5  ;;  %s1561_s14 = int_to_ptr.vmem [resolvable:$true] %s204_s14 }
  0x17   : > { %s193_s16 = scalar_lea.sflag [#allocation5], %s1546_s7  ;;  %s1311_s17 = scalar_lea.hbm %s1553_s12, 128 }
  0x18   : > { %p1312_p2 = scmp.ne.s32.totalorder %s1553_s12, %s1311_s17  ;;  %p1313_p3 = pneg %p1557_p13 }
  0x19   : > { %s1316_s26 = scalar_lea.hbm %s1922_s0, 256  ;;  %p1317_p5 = scmp.lt.s32.totalorder %s1553_s12, %s1922_s0 }
  0x1a   : > { %p1314_p4 = pnand %p1313_p3, %p1312_p2  ;;  %p1318_p8 = scmp.lt.s32.totalorder %s1316_s26, %s1311_s17 }
  0x1c   : > { %p1315_p7 = pneg %p1314_p4  ;;  %p1319_p10 = por %p1318_p8, %p1317_p5 }
  0x1e   : > { %p1320_p9 = pnand %p1319_p10, %p1315_p7 }
  0x20   : > { %1323 = shalt.err (!%p1320_p9)
}
  0x21   : > { %s1324_s9 = scalar_lea.vmem %s1561_s14, 128  ;;  %s1437_s10 = smov [#allocation4]  }
  0x22   : > { %p1325_p0 = scmp.ne.s32.totalorder %s1561_s14, %s1324_s9  ;;  %s1329_s11 = sshll.u32 %s1437_s10, 4  ;;  %s1330_s11 = int_to_ptr.vmem [resolvable:$false] %s1329_s11 }
  0x23   : > { %s1331_s13 = scalar_lea.vmem %s1330_s11, 256  ;;  %p1332_p1 = scmp.lt.s32.totalorder %s1561_s14, %s1330_s11 }
  0x24   : > { %p1327_p2 = pnand %p1325_p0, %p1313_p3  ;;  %p1333_p12 = scmp.lt.s32.totalorder %s1331_s13, %s1324_s9 }
  0x26   : > { %p1328_p4 = pneg %p1327_p2  ;;  %p1334_p11 = por %p1333_p12, %p1332_p1 }
  0x28   : > { %p1335_p5 = pnand %p1334_p11, %p1328_p4 }
  0x2a   : > { %1338 = shalt.err (!%p1335_p5)
}
  0x2b   : > { %1219 = dma.hbm_to_vmem [thread:$0]  (!%p1557_p13), %s1553_s12, 128, %s1561_s14, %s193_s16  }
  0x2c   : > { %p1938_p9 = scmp.lt.s32.totalorder %s1435_s21, 3  ;;  %p1939_p0 = scmp.ge.s32.totalorder %s1435_s21, 1 }
  0x2d   : > { %s1187_s23 = sshll.u32 %s1546_s7, 2  ;;  %s1188_s25 = sshll.u32 %s1435_s21, 6 }
  0x2e   : > { %p1594_p7 = pnand %p1939_p0, %p1938_p9  ;;  %s1603_s8 = scalar_lea.hbm %s1923_s1, %s1188_s25 }
  0x2f   : > { %s215_s9 = scalar_lea.vmem [#allocation7], %s1187_s23  ;;  %s212_s12 = scalar_lea.sflag [#allocation8], %s1546_s7 }
  0x30   : > { %s1940_s17 = scalar_select %p1594_p7, 1, 0 }
  0x31   : > { %s222_s10 = sshll.u32 %s215_s9, 4  ;;  %s1339_s14 = scalar_lea.hbm %s1603_s8, 64  ;;  %s223_s10 = int_to_ptr.vmem [resolvable:$true] %s222_s10 }
  0x32   : > { %p1340_p11 = scmp.ne.s32.totalorder %s1603_s8, %s1339_s14  ;;  %s1344_s13 = scalar_lea.hbm %s1923_s1, 128 }
  0x33   : > { %p1345_p8 = scmp.lt.s32.totalorder %s1603_s8, %s1923_s1  ;;  %p1346_p10 = scmp.lt.s32.totalorder %s1344_s13, %s1339_s14 }
  0x34   : > { %p1342_p12 = pnand %p1340_p11, %p1313_p3 }
  0x35   : > { %p1347_p2 = por %p1346_p10, %p1345_p8 }
  0x36   : > { %p1343_p1 = pneg %p1342_p12 }
  0x38   : > { %p1348_p4 = pnand %p1347_p2, %p1343_p1 }
  0x3a   : > { %1351 = shalt.err (!%p1348_p4)
}
  0x3b   : > { %s1352_s23 = scalar_lea.vmem %s223_s10, 64  ;;  %s1438_s7 = smov [#allocation7]  }
  0x3c   : > { %p1353_p5 = scmp.ne.s32.totalorder %s223_s10, %s1352_s23  ;;  %s1357_s28 = sshll.u32 %s1438_s7, 4  ;;  %s1358_s28 = int_to_ptr.vmem [resolvable:$false] %s1357_s28 }
  0x3d   : > { %s1359_s9 = scalar_lea.vmem %s1358_s28, 128  ;;  %p1360_p11 = scmp.lt.s32.totalorder %s223_s10, %s1358_s28 }
  0x3e   : > { %p1355_p9 = pnand %p1353_p5, %p1313_p3  ;;  %p1361_p12 = scmp.lt.s32.totalorder %s1359_s9, %s1352_s23 }
  0x40   : > { %p1356_p0 = pneg %p1355_p9  ;;  %p1362_p6 = por %p1361_p12, %p1360_p11 }
  0x42   : > { %p1363_p7 = pnand %p1362_p6, %p1356_p0 }
  0x44   : > { %1366 = shalt.err (!%p1363_p7)
}
  0x45   : > { %1222 = dma.hbm_to_vmem [thread:$0]  (!%p1557_p13), %s1603_s8, 64, %s223_s10, %s212_s12  }
  0x46   : > { %p1941_p1 = scmp.ne.s32.totalorder %s1940_s17, 0 }
  0x47   : > { %s1627_s14 = sand.u32 (!%p1941_p1), 1, %s1427_s19   ;;  %p1942_p6 = scmp.ne.s32.totalorder (!%p1941_p1), %s1934_s29, 0 }
  0x48   : > { %231 = sbr.rel (%p1941_p1) target bundleno = 1817 (0x719), region = 40  ;;  %s1190_s16 = sshll.u32 (!%p1941_p1), %s1627_s14, 3 }
  0x49   : > { %s234_s11 = scalar_lea.sflag (!%p1941_p1), [#allocation5], %s1627_s14  ;;  %s237_s13 = scalar_lea.vmem (!%p1941_p1), [#allocation4], %s1190_s16 }
  0x4d   : > { %1410 = dma.done.wait (%p1942_p6), %s234_s11, 128  }
  0x4e   : > { %1412 = vsyncadd (%p1942_p6), %s234_s11, 4294967168  ;;  %s1191_s15 = sshll.u32 %s1627_s14, 2  ;;  %s243_s17 = scalar_lea.sflag [#allocation8], %s1627_s14 }
  0x4f   : > { %s246_s8 = scalar_lea.vmem [#allocation7], %s1191_s15 }
  0x50   : > { %1414 = dma.done.wait (%p1942_p6), %s243_s17, 64  }
  0x51   : > { %1416 = vsyncadd (%p1942_p6), %s243_s17, 4294967232  ;;  %vm313_vm0 = vcmask 1043456   ;;  %v1643_v0 = vld [vmem:[%s237_s13] sm:$0xff]  ;;  %v1439_v10 = vmov 1   ;;  %v1655_v11 = vld [vmem:[%s246_s8] sm:$0xf]  ;;  %v280_v44 = vlaneseq }
  0x52   : > { %v311_v1 = vcombine.high %v1643_v0, %v1643_v0  ;;  %v314_v2 = vsel %vm313_vm0, %v1643_v0, 0.0  ;;  %v319_v3 = vmul.f32 %v1643_v0, %v1643_v0  ;;  %1278 = vset.pattern.permute.xlu1 %v1439_v10  ;;  %v1440_v12 = vmov 2   ;;  %s1444_s29 = smov 17   ;;  %s1445_s10 = smov 94  }
  0x53   : > { %1280 = vset.pattern.permute.xlu0 %v1440_v12  ;;  %v1441_v13 = vmov 0   ;;  %vm308_vm1 = vcmask 273408   ;;  %v1442_v38 = vmov 0.0   ;;  %v1443_v45 = vmov 839922192   ;;  %s1446_s12 = smov 112  }
  0x54   : > { %v315_v4 = vsel %vm313_vm0, %v311_v1, 0.0  ;;  %v321_v5 = vcombine.high %v319_v3, %v319_v3  ;;  %v323_v6 = vsel %vm313_vm0, %v319_v3, 0.0  ;;  %307 = vst [vmem:[#allocation2] sm:$0xff] %v1442_v38  ;;  %309 = vst.msk [vmem:[#allocation2 + $0x8] sm:$0xf] %vm308_vm1, %v1442_v38  ;;  %711 = vmatprep.mubr.f32.mxu0 %v1442_v38  ;;  %1060 = vmatprep.mubr.f32.mxu1 %v1442_v38  ;;  %v334_v46 = vunpack.c.l.s4 %v1443_v45  ;;  %s1447_s26 = smov 110  }
  0x55   : > { %v316_v7 = vadd.f32 %v315_v4, %v314_v2  ;;  %v337_v48 = vshrl.u32 %v280_v44, 7  ;;  %vm427_vm4 = vcmask 1043592   ;;  %vm428_vm5 = vcmask 1047556   ;;  %s1448_s25 = smov 111   ;;  %s1449_s23 = smov 96  }
  0x56   : > { %v324_v8 = vsel %vm313_vm0, %v321_v5, 0.0  ;;  %v335_v47 = vunpack.c.0.s8 %v334_v46  ;;  %vm423_vm6 = vcmask 138240   ;;  %vm431_vm7 = vcmask 134144   ;;  %vm1666_vm8 = vmor %vm428_vm5, %vm427_vm4  ;;  %s1450_s7 = smov 126   ;;  %s1451_s28 = smov 95  }
  0x57   : > { %317 = vadd.xlane.f32.xlu0 %v316_v7  ;;  %v325_v9 = vadd.f32 %v324_v8, %v323_v6  ;;  %s1452_s9 = smov 127   ;;  %vm594_vm11 = vcmask 777216   ;;  %vm459_vm12 = vcmask 1039360   ;;  %vm612_vm13 = vcmask 769024   ;;  %s1074_s11 = scalar_lea.sflag [#allocation6], %s1627_s14 }
  0x58   : > { %v338_v49 = vsub.s32 %v335_v47, %v337_v48  ;;  %vm547_vm1 = vcmask 900096   ;;  %vm1932_vm4 = vcmask 908288   ;;  %vm1930_vm5 = vcmask 1031168   ;;  %p1958_p3 = scmp.ne.s32.totalorder %s1935_s30, 0  ;;  %s1456_s15 = smov [#allocation9]  }
  0x5b   : > { %326 = vadd.xlane.f32.xlu0 %v325_v9 }
  0x71   : > { %401 = vperm.xlu0 %1280, %v1655_v11  }
  0x75   : > { %1281 = vset.pattern.permute.xlu0 %v1441_v13 }
  0xe0   : > { %v318_v14 = vpop.xlane.xlu0 %317 }
  0xe1   : > { %v328_v15 = vmul.f32 0.00390625, %v318_v14 }
  0xe3   : > { %v354_v16 = vsel %vm313_vm0, %v328_v15, 0.0  ;;  %v330_v41 = vmul.f32 %v328_v15, %v328_v15  ;;  %v339_v51 = vrot.slane %v328_v15, %v338_v49 }
  0xe4   : > { %v355_v17 = vrot.slane %v354_v16, 4  ;;  %v327_v39 = vpop.xlane.xlu0 %326 }
  0xe5   : > { %v329_v40 = vmul.f32 0.00390625, %v327_v39  ;;  %v341_v53 = vsub.f32 %v1643_v0, %v339_v51 }
  0xe6   : > { %v356_v18 = vadd.f32 %v355_v17, %v354_v16 }
  0xe7   : > { %v331_v42 = vsub.f32 %v329_v40, %v330_v41 }
  0xe8   : > { %v357_v19 = vrot.slane %v356_v18, 2 }
  0xe9   : > { %v342_v43 = vadd.f32 1e-05, %v331_v42 }
  0xea   : > { %v358_v20 = vadd.f32 %v357_v19, %v356_v18 }
  0xec   : > { %v359_v21 = vrot.slane %v358_v20, 1  ;;  %v402_v60 = vpop.permute.xlu0 %401 }
  0xee   : > { %v360_v22 = vadd.f32 %v359_v21, %v358_v20 }
  0xf0   : > { %v362_v23 = vmul.f32 0.25, %v360_v22 }
  0xf2   : > { %v363_v24 = vsub.f32 %v328_v15, %v362_v23 }
  0xf4   : > { %v364_v25 = vmul.f32 %v363_v24, %v363_v24 }
  0xf6   : > { %v365_v26 = vsel %vm313_vm0, %v364_v25, 0.0 }
  0xf7   : > { %v366_v27 = vrot.slane %v365_v26, 4 }
  0xf9   : > { %v367_v28 = vadd.f32 %v366_v27, %v365_v26 }
  0xfb   : > { %v368_v29 = vrot.slane %v367_v28, 2 }
  0xfd   : > { %v369_v30 = vadd.f32 %v368_v29, %v367_v28 }
  0xff   : > { %v370_v31 = vrot.slane %v369_v30, 1 }
 0x101   : > { %v371_v32 = vadd.f32 %v370_v31, %v369_v30 }
 0x103   : > { %v372_v33 = vmul.f32 0.33333334, %v371_v32 }
 0x105   : > { %v373_v34 = vadd.f32 1e-05, %v372_v33 }
 0x107   : > { %1295 = vrsqrt.f32 %v373_v34 }
 0x108   : > { %1297 = vrsqrt.f32 %v342_v43 }
 0x114   : > { %v1296_v35 = vpop.eup %1295 }
 0x115   : > { %v375_v36 = vmul.f32 %v1296_v35, %v363_v24  ;;  %v1298_v50 = vpop.eup %1297 }
 0x116   : > { %v351_v52 = vrot.slane %v1298_v50, %v338_v49 }
 0x117   : > { %v376_v37 = vmul.f32 %v375_v36, %v1655_v11  ;;  %v416_v36 = vld [vmem:[%s1926_s4] sm:$0xf] }
 0x118   : > { %v353_v55 = vmul.f32 %v351_v52, %v341_v53 }
 0x119   : > { %379 = vperm.xlu1 %1278, %v376_v37  }
 0x11d   : > { %1279 = vset.pattern.permute.xlu1 %v1441_v13  ;;  %v1664_v13 = vand.u32 127, %v280_v44 }
 0x11e   : > { %392 = vperm.xlu1 %1279, %v1655_v11  }
 0x11f   : > { %v1673_v18 = vadd.s32 128, %v1664_v13  ;;  %v287_v19 = vand.u32 15, %v1664_v13 }
 0x121   : > { %v294_v20 = vand.u32 15, %v1673_v18  ;;  %vm1681_vm9 = vcmp.eq.s32.totalorder %v287_v19, 0  ;;  %vm1735_vm14 = vcmp.eq.s32.totalorder %v287_v19, 15 }
 0x123   : > { %vm1689_vm10 = vcmp.eq.s32.totalorder %v294_v20, 0  ;;  %vm1741_vm15 = vcmp.eq.s32.totalorder %v294_v20, 15 }
 0x194   : > { %v380_v54 = vpop.permute.xlu1 %379 }
 0x195   : > { %v387_v56 = vrot.slane %v380_v54, %v338_v49 }
 0x197   : > { %v389_v57 = vadd.f32 %v387_v56, %v353_v55 }
 0x199   : > { %v393_v58 = vpop.permute.xlu1 %392  ;;  %v396_v59 = vcombine.high %v389_v57, %v389_v57 }
 0x19a   : > { %v398_v61 = vmul.f32 %v393_v58, %v389_v57 }
 0x19b   : > { %v399_v62 = vmul.f32 %v396_v59, %v393_v58 }
 0x19c   : > { %v404_v63 = vadd.f32 %v402_v60, %v398_v61 }
 0x19d   : > { %v405_v1 = vadd.f32 %v402_v60, %v399_v62 }
 0x19e   : > { %v408_v2 = vmul.f32 1.442695, %v404_v63  ;;  %vm406_vm2 = vcmp.gt.f32.partialorder %v404_v63, 0.0 }
 0x19f   : > { %v410_v3 = vmul.f32 1.442695, %v405_v1  ;;  %vm407_vm3 = vcmp.gt.f32.partialorder %v405_v1, 0.0 }
 0x1a0   : > { %1299 = vpow2.f32 %v408_v2 }
 0x1a1   : > { %1301 = vpow2.f32 %v410_v3 }
 0x1ad   : > { %v1300_v4 = vpop.eup %1299 }
 0x1ae   : > { %v1302_v5 = vpop.eup %1301  ;;  %v1193_v6 = vadd.f32 -1.0, %v1300_v4 }
 0x1af   : > { %v1194_v7 = vadd.f32 -1.0, %v1302_v5 }
 0x1b0   : > { %v414_v8 = vsel %vm406_vm2, %v404_v63, %v1193_v6  ;;  %vm573_vm2 = vcmask 785408  }
 0x1b1   : > { %v415_v9 = vsel %vm407_vm3, %v405_v1, %v1194_v7  ;;  %vm503_vm3 = vcmask 916480  }
 0x1b2   : > { %v419_v12 = vcombine.low %v414_v8, %v415_v9 }
 0x1b4   : > { %420 = vrot.lane.b32.xlu1 %v419_v12, %s1444_s29 }
 0x226   : > { %v421_v14 = vpop.permute.xlu1 %420 }
 0x227   : > { %v422_v16 = vrot.slane %v421_v14, 4 }
 0x229   : > { %v424_v17 = vsel %vm423_vm6, %v422_v16, %v421_v14  ;;  %432 = vst.msk [vmem:[#allocation2 + $0x8] sm:$0xf] %vm431_vm7, %v422_v16 }
 0x22a   : > { %430 = vst.msk [vmem:[#allocation2] sm:$0xff] %vm1666_vm8, %v424_v17 }
 0x230   : > { %v602_v21 = vld [vmem:[#allocation2 + $0x8] sm:$0xf] }
 0x231   : > { %v493_v22 = vld [vmem:[#allocation2 + $0x8] sm:$0xf]  ;;  %610 = vrot.lane.b32.xlu1 %v602_v21, %s1445_s10  ;;  %v601_v24 = vld [vmem:[#allocation2] sm:$0xff] }
 0x232   : > { %501 = vrot.lane.b32.xlu0 %v493_v22, %s1446_s12  ;;  %v605_v26 = vcombine.high %v601_v24, %v601_v24  ;;  %v443_v27 = vsel %vm1681_vm9, 0.0, %v601_v24  ;;  %v537_v28 = vld [vmem:[#allocation2 + $0x8] sm:$0xf]  ;;  %v586_v35 = vcombine.low %v601_v24, %v601_v24 }
 0x233   : > { %v519_v29 = vld [vmem:[#allocation2 + $0x8] sm:$0xf]  ;;  %445 = vst [vmem:[#allocation3 + $0x30] sm:$0xf] %v443_v27 }
 0x234   : > { %v444_v30 = vsel %vm1689_vm10, 0.0, %v605_v26  ;;  %v563_v31 = vld [vmem:[#allocation2 + $0x8] sm:$0xf] }
 0x235   : > { %545 = vrot.lane.b32.xlu1 %v537_v28, %s1447_s26  ;;  %446 = vst [vmem:[#allocation3] sm:$0xf] %v444_v30  ;;  %v467_v32 = vld [vmem:[#allocation2 + $0x8] sm:$0xf] }
 0x236   : > { %527 = vrot.lane.b32.xlu0 %v519_v29, %s1448_s25  ;;  %v1287_v33 = vld [vmem:[#allocation2 + $0x8] ss:$0 sps:$4 sm:$0xff]  }
 0x237   : > { %v1288_v34 = vld [vmem:[#allocation2 + $0x8] ss:$0 sps:$4 sm:$0xff]  }
 0x239   : > { %571 = vrot.lane.b32.xlu1 %v563_v31, %s1449_s23 }
 0x23a   : > { %481 = vrot.lane.b32.xlu0 %v467_v32, %s1450_s7 }
 0x23d   : > { %606 = vrot.lane.b32.xlu1 %v601_v24, %s1445_s10 }
 0x23e   : > { %497 = vrot.lane.b32.xlu0 %v601_v24, %s1446_s12 }
 0x241   : > { %541 = vrot.lane.b32.xlu1 %v601_v24, %s1447_s26 }
 0x242   : > { %592 = vrot.lane.b32.xlu0 %v1287_v33, %s1451_s28 }
 0x245   : > { %567 = vrot.lane.b32.xlu1 %v601_v24, %s1449_s23 }
 0x246   : > { %477 = vrot.lane.b32.xlu0 %v601_v24, %s1450_s7 }
 0x249   : > { %590 = vrot.lane.b32.xlu1 %v601_v24, %s1451_s28 }
 0x24a   : > { %457 = vrot.lane.b32.xlu0 %v1288_v34, %s1452_s9 }
 0x24d   : > { %523 = vrot.lane.b32.xlu1 %v601_v24, %s1448_s25 }
 0x24e   : > { %634 = vperm.xlu0 %1281, %v416_v36  }
 0x251   : > { %455 = vrot.lane.b32.xlu1 %v601_v24, %s1452_s9 }
 0x255   : > { %608 = vrot.lane.b32.xlu1 %v605_v26, %s1445_s10 }
 0x259   : > { %543 = vrot.lane.b32.xlu1 %v605_v26, %s1447_s26 }
 0x25d   : > { %569 = vrot.lane.b32.xlu1 %v605_v26, %s1449_s23 }
 0x261   : > { %499 = vrot.lane.b32.xlu1 %v605_v26, %s1446_s12 }
 0x265   : > { %588 = vrot.lane.b32.xlu1 %v586_v35, %s1451_s28 }
 0x269   : > { %525 = vrot.lane.b32.xlu1 %v605_v26, %s1448_s25 }
 0x26d   : > { %479 = vrot.lane.b32.xlu1 %v605_v26, %s1450_s7 }
 0x271   : > { %453 = vrot.lane.b32.xlu1 %v586_v35, %s1452_s9 }
 0x2a3   : > { %v611_v37 = vpop.permute.xlu1 %610 }
 0x2a4   : > { %v502_v38 = vpop.permute.xlu0 %501 }
 0x2a7   : > { %v546_v39 = vpop.permute.xlu1 %545 }
 0x2a8   : > { %v1722_v40 = vpop.permute.xlu0 %527 }
 0x2ab   : > { %v572_v41 = vpop.permute.xlu1 %571 }
 0x2ac   : > { %v1724_v42 = vpop.permute.xlu0 %481 }
 0x2af   : > { %v607_v43 = vpop.permute.xlu1 %606 }
 0x2b0   : > { %v498_v44 = vpop.permute.xlu0 %497 }
 0x2b3   : > { %v542_v45 = vpop.permute.xlu1 %541 }
 0x2b4   : > { %v593_v46 = vpop.permute.xlu0 %592 }
 0x2b7   : > { %v568_v47 = vpop.permute.xlu1 %567 }
 0x2b8   : > { %v1727_v50 = vpop.permute.xlu0 %477 }
 0x2bb   : > { %v591_v48 = vpop.permute.xlu1 %590 }
 0x2bc   : > { %v596_v49 = vsel %vm594_vm11, %v591_v48, %v593_v46  ;;  %v458_v52 = vpop.permute.xlu0 %457 }
 0x2bd   : > { %600 = vst [vmem:[#allocation3 + $0x20] sm:$0xf0] %v596_v49 }
 0x2bf   : > { %v524_v51 = vpop.permute.xlu1 %523 }
 0x2c3   : > { %v1729_v53 = vpop.permute.xlu1 %455 }
 0x2c4   : > { %v461_v54 = vsel %vm459_vm12, %v1729_v53, %v458_v52 }
 0x2c5   : > { %465 = vst [vmem:[#allocation3] sm:$0xf0] %v461_v54 }
 0x2c7   : > { %v609_v57 = vpop.permute.xlu1 %608 }
 0x2c8   : > { %v613_v58 = vsel %vm612_vm13, %v607_v43, %v609_v57  ;;  %v614_v59 = vsel %vm612_vm13, %v609_v57, %v611_v37 }
 0x2c9   : > { %v617_v60 = vsel %vm1735_vm14, 0.0, %v613_v58  ;;  %v618_v61 = vsel %vm1741_vm15, 0.0, %v614_v59  ;;  %v635_v46 = vpop.permute.xlu0 %634 }
 0x2ca   : > { %619 = vst [vmem:[#allocation3 + $0x40] sm:$0xf] %v617_v60  ;;  %620 = vst [vmem:[#allocation3 + $0x38] sm:$0xf] %v618_v61  ;;  %v1453_v61 = vmov 4  }
 0x2cb   : > { %v544_v62 = vpop.permute.xlu1 %543  ;;  %1283 = vset.pattern.permute.xlu1 %v1453_v61 }
 0x2cc   : > { %v548_v63 = vsel %vm547_vm1, %v542_v45, %v544_v62  ;;  %v549_v1 = vsel %vm547_vm1, %v544_v62, %v546_v39  ;;  %v623_v43 = vld [vmem:[#allocation3] sm:$0xff]  ;;  %v1454_v62 = vmov 3  }
 0x2cd   : > { %v552_v2 = vsel %vm1735_vm14, 0.0, %v548_v63  ;;  %v553_v3 = vsel %vm1741_vm15, 0.0, %v549_v1  ;;  %1282 = vset.pattern.permute.xlu0 %v1454_v62 }
 0x2ce   : > { %v556_v4 = vrot.slane %v552_v2, 4  ;;  %v557_v5 = vrot.slane %v553_v3, 4 }
 0x2cf   : > { %v570_v6 = vpop.permute.xlu1 %569 }
 0x2d0   : > { %560 = vst [vmem:[#allocation3 + $0x48] sm:$0xf0] %v556_v4  ;;  %561 = vst [vmem:[#allocation3 + $0x28] sm:$0xf0] %v557_v5  ;;  %v574_v7 = vsel %vm573_vm2, %v568_v47, %v570_v6  ;;  %v575_v8 = vsel %vm573_vm2, %v570_v6, %v572_v41 }
 0x2d1   : > { %v578_v9 = vsel %vm1681_vm9, 0.0, %v574_v7  ;;  %v579_v12 = vsel %vm1689_vm10, 0.0, %v575_v8  ;;  %v631_v13 = vld [vmem:[#allocation3 + $0x38] sm:$0xf]  ;;  %v630_v14 = vld [vmem:[#allocation3 + $0x40] sm:$0xf] }
 0x2d2   : > { %580 = vst [vmem:[#allocation3 + $0x8] sm:$0xf] %v578_v9  ;;  %581 = vst [vmem:[#allocation3 + $0x20] sm:$0xf] %v579_v12  ;;  %1195 = vmatprep.subr.msk.mxu0 %vm313_vm0, %v631_v13 }
 0x2d3   : > { %1196 = vmatpush1.msk.msra.mxu0 %vm313_vm0, %v630_v14  ;;  %v500_v16 = vpop.permute.xlu1 %499 }
 0x2d4   : > { %v504_v17 = vsel %vm503_vm3, %v498_v44, %v500_v16  ;;  %v505_v18 = vsel %vm503_vm3, %v500_v16, %v502_v38  ;;  %v621_v44 = vld [vmem:[%s1924_s2] sm:$0xf] }
 0x2d5   : > { %v508_v19 = vsel %vm1681_vm9, 0.0, %v504_v17  ;;  %v509_v20 = vsel %vm1689_vm10, 0.0, %v505_v18 }
 0x2d6   : > { %v512_v21 = vrot.slane %v508_v19, 4  ;;  %v513_v22 = vrot.slane %v509_v20, 4 }
 0x2d7   : > { %v589_v24 = vpop.permute.xlu1 %588 }
 0x2d8   : > { %516 = vst [vmem:[#allocation3 + $0x18] sm:$0xf0] %v512_v21  ;;  %517 = vst [vmem:[#allocation3 + $0x10] sm:$0xf0] %v513_v22  ;;  %v595_v26 = vsel %vm594_vm11, %v589_v24, %v591_v48 }
 0x2d9   : > { %599 = vst [vmem:[#allocation3 + $0x8] sm:$0xf0] %v595_v26  ;;  %v629_v27 = vld [vmem:[#allocation3 + $0x20] sm:$0xff] }
 0x2da   : > { %671 = vmatprep.subr.mxu0 %v629_v27 }
 0x2db   : > { %v526_v28 = vpop.permute.xlu1 %525 }
 0x2dc   : > { %v530_v29 = vsel %vm1932_vm4, %v524_v51, %v526_v28  ;;  %v531_v30 = vsel %vm1932_vm4, %v526_v28, %v1722_v40  ;;  %v1455_v28 = vmov 5  }
 0x2dd   : > { %534 = vst [vmem:[#allocation3 + $0x48] sm:$0xf] %v530_v29  ;;  %535 = vst [vmem:[#allocation3 + $0x28] sm:$0xf] %v531_v30 }
 0x2df   : > { %v480_v31 = vpop.permute.xlu1 %479 }
 0x2e0   : > { %v484_v32 = vsel %vm1930_vm5, %v1727_v50, %v480_v31  ;;  %v485_v33 = vsel %vm1930_vm5, %v480_v31, %v1724_v42  ;;  %v628_v34 = vld [vmem:[#allocation3 + $0x8] sm:$0xff]  ;;  %vm1931_vm5 = vcmask 293888  }
 0x2e1   : > { %v488_v35 = vsel %vm1735_vm14, 0.0, %v484_v32  ;;  %v489_v36 = vsel %vm1741_vm15, 0.0, %v485_v33  ;;  %672 = vmatpush1.msra.mxu0 %v628_v34 }
 0x2e2   : > { %490 = vst [vmem:[#allocation3 + $0x18] sm:$0xf] %v488_v35  ;;  %491 = vst [vmem:[#allocation3 + $0x10] sm:$0xf] %v489_v36 }
 0x2e3   : > { %v454_v37 = vpop.permute.xlu1 %453 }
 0x2e4   : > { %v460_v38 = vsel %vm459_vm12, %v454_v37, %v1729_v53  ;;  %v627_v39 = vld [vmem:[#allocation3 + $0x28] sm:$0xff] }
 0x2e5   : > { %v626_v40 = vld [vmem:[#allocation3 + $0x48] sm:$0xff]  ;;  %464 = vst [vmem:[#allocation3 + $0x30] sm:$0xf0] %v460_v38  ;;  %673 = vmatprep.subr.mxu0 %v627_v39 }
 0x2e6   : > { %674 = vmatpush1.msra.mxu0 %v626_v40 }
 0x2e9   : > { %v625_v41 = vld [vmem:[#allocation3 + $0x10] sm:$0xff]  ;;  %v624_v42 = vld [vmem:[#allocation3 + $0x18] sm:$0xff] }
 0x2ea   : > { %675 = vmatprep.subr.mxu0 %v625_v41 }
 0x2eb   : > { %676 = vmatpush1.msra.mxu0 %v624_v42 }
 0x2ec   : > { %677 = vmatprep.subr.mxu0 %v623_v43  ;;  %v622_v45 = vld [vmem:[#allocation3 + $0x30] sm:$0xff] }
 0x2ed   : > { %678 = vmatpush1.msra.mxu0 %v622_v45 }
 0x2ee   : > { %1197 = vmatmul.mubr.msk.f32.vlgmr.msra.gmra.mxu0 %vm1931_vm5, %v621_v44 }
 0x3ae   : > { %v713_v47 = vpop.f32.mrf.mxu0 }
 0x3af   : > { %v714_v48 = vadd.f32 %v713_v47, %v635_v46 }
 0x3b0   : > { %v715_v49 = vpop.f32.mrf.mxu0 }
 0x3b1   : > { %v716_v50 = vadd.f32 %v715_v49, %v635_v46  ;;  %v723_v51 = vmul.f32 %v714_v48, %v714_v48  ;;  %v718_v52 = vsel %vm313_vm0, %v714_v48, 0.0 }
 0x3b3   : > { %v719_v53 = vsel %vm313_vm0, %v716_v50, 0.0  ;;  %v724_v54 = vmul.f32 %v716_v50, %v716_v50  ;;  %v725_v58 = vsel %vm313_vm0, %v723_v51, 0.0 }
 0x3b4   : > { %v720_v57 = vadd.f32 %v719_v53, %v718_v52 }
 0x3b5   : > { %v726_v59 = vsel %vm313_vm0, %v724_v54, 0.0 }
 0x3b6   : > { %721 = vadd.xlane.f32.xlu1 %v720_v57  ;;  %v727_v60 = vadd.f32 %v726_v59, %v725_v58 }
 0x3b8   : > { %728 = vadd.xlane.f32.xlu0 %v727_v60 }
 0x3ce   : > { %770 = vperm.xlu0 %1282, %v1655_v11  }
 0x3d2   : > { %1285 = vset.pattern.permute.xlu0 %v1439_v10 }
 0x43f   : > { %v722_v63 = vpop.xlane.xlu1 %721 }
 0x440   : > { %v730_v1 = vmul.f32 0.00390625, %v722_v63 }
 0x441   : > { %v729_v29 = vpop.xlane.xlu0 %728 }
 0x442   : > { %v740_v2 = vsel %vm313_vm0, %v730_v1, 0.0  ;;  %v731_v30 = vmul.f32 0.00390625, %v729_v29  ;;  %v732_v31 = vmul.f32 %v730_v1, %v730_v1  ;;  %v734_v35 = vsub.f32 %v714_v48, %v730_v1 }
 0x443   : > { %v741_v3 = vrot.slane %v740_v2, 4  ;;  %v735_v36 = vsub.f32 %v716_v50, %v730_v1 }
 0x444   : > { %v733_v32 = vsub.f32 %v731_v30, %v732_v31 }
 0x445   : > { %v742_v4 = vadd.f32 %v741_v3, %v740_v2 }
 0x446   : > { %v736_v33 = vadd.f32 1e-05, %v733_v32 }
 0x447   : > { %v743_v5 = vrot.slane %v742_v4, 2 }
 0x449   : > { %v744_v6 = vadd.f32 %v743_v5, %v742_v4  ;;  %v771_v40 = vpop.permute.xlu0 %770 }
 0x44b   : > { %v745_v7 = vrot.slane %v744_v6, 1 }
 0x44d   : > { %v746_v8 = vadd.f32 %v745_v7, %v744_v6 }
 0x44f   : > { %v747_v9 = vmul.f32 0.25, %v746_v8 }
 0x451   : > { %v748_v12 = vsub.f32 %v730_v1, %v747_v9 }
 0x453   : > { %v749_v13 = vmul.f32 %v748_v12, %v748_v12 }
 0x455   : > { %v750_v14 = vsel %vm313_vm0, %v749_v13, 0.0 }
 0x456   : > { %v751_v16 = vrot.slane %v750_v14, 4 }
 0x458   : > { %v752_v17 = vadd.f32 %v751_v16, %v750_v14 }
 0x45a   : > { %v753_v18 = vrot.slane %v752_v17, 2 }
 0x45c   : > { %v754_v19 = vadd.f32 %v753_v18, %v752_v17 }
 0x45e   : > { %v755_v10 = vrot.slane %v754_v19, 1 }
 0x460   : > { %v756_v20 = vadd.f32 %v755_v10, %v754_v19 }
 0x462   : > { %v757_v21 = vmul.f32 0.33333334, %v756_v20 }
 0x464   : > { %v758_v22 = vadd.f32 1e-05, %v757_v21 }
 0x466   : > { %1303 = vrsqrt.f32 %v758_v22 }
 0x467   : > { %1305 = vrsqrt.f32 %v736_v33 }
 0x473   : > { %v1304_v24 = vpop.eup %1303 }
 0x474   : > { %v760_v26 = vmul.f32 %v1304_v24, %v748_v12  ;;  %v1306_v34 = vpop.eup %1305  ;;  %v791_v12 = vld [vmem:[%s1926_s4] sm:$0xf] }
 0x475   : > { %v738_v37 = vmul.f32 %v1306_v34, %v734_v35  ;;  %v739_v38 = vmul.f32 %v1306_v34, %v735_v36 }
 0x476   : > { %v761_v27 = vmul.f32 %v760_v26, %v1655_v11 }
 0x478   : > { %764 = vperm.xlu1 %1283, %v761_v27  }
 0x47c   : > { %1284 = vset.pattern.permute.xlu1 %v1455_v28 }
 0x47d   : > { %776 = vperm.xlu1 %1284, %v1655_v11  }
 0x4f3   : > { %v765_v39 = vpop.permute.xlu1 %764 }
 0x4f4   : > { %v767_v41 = vadd.f32 %v765_v39, %v738_v37  ;;  %v768_v42 = vadd.f32 %v765_v39, %v739_v38 }
 0x4f6   : > { %v773_v43 = vmul.f32 %v771_v40, %v767_v41  ;;  %v774_v44 = vmul.f32 %v771_v40, %v768_v42 }
 0x4f8   : > { %v777_v45 = vpop.permute.xlu1 %776 }
 0x4f9   : > { %v779_v46 = vadd.f32 %v777_v45, %v773_v43  ;;  %v780_v11 = vadd.f32 %v777_v45, %v774_v44 }
 0x4fb   : > { %v783_v47 = vmul.f32 1.442695, %v779_v46  ;;  %v785_v49 = vmul.f32 1.442695, %v780_v11  ;;  %vm781_vm5 = vcmp.gt.f32.partialorder %v779_v46, 0.0  ;;  %vm782_vm4 = vcmp.gt.f32.partialorder %v780_v11, 0.0 }
 0x4fd   : > { %1307 = vpow2.f32 %v783_v47 }
 0x4fe   : > { %1309 = vpow2.f32 %v785_v49 }
 0x50a   : > { %v1308_v51 = vpop.eup %1307 }
 0x50b   : > { %v1310_v52 = vpop.eup %1309  ;;  %v1198_v53 = vadd.f32 -1.0, %v1308_v51 }
 0x50c   : > { %v1199_v48 = vadd.f32 -1.0, %v1310_v52 }
 0x50d   : > { %v789_v50 = vsel %vm781_vm5, %v779_v46, %v1198_v53 }
 0x50e   : > { %v790_v54 = vsel %vm782_vm4, %v780_v11, %v1199_v48 }
 0x50f   : > { %v794_v57 = vcombine.low %v789_v50, %v790_v54 }
 0x511   : > { %795 = vrot.lane.b32.xlu1 %v794_v57, %s1444_s29 }
 0x583   : > { %v796_v58 = vpop.permute.xlu1 %795 }
 0x584   : > { %v797_v59 = vrot.slane %v796_v58, 4 }
 0x586   : > { %v798_v60 = vsel %vm423_vm6, %v797_v59, %v796_v58  ;;  %802 = vst.msk [vmem:[#allocation2 + $0x8] sm:$0xf] %vm431_vm7, %v797_v59  ;;  %vm1955_vm7 = vcmask 1031168  }
 0x587   : > { %801 = vst.msk [vmem:[#allocation2] sm:$0xff] %vm1666_vm8, %v798_v60  ;;  %vm1956_vm8 = vmmov %vm1955_vm7 }
 0x58d   : > { %v953_v61 = vld [vmem:[#allocation2 + $0x8] sm:$0xf] }
 0x58e   : > { %v916_v62 = vld [vmem:[#allocation2 + $0x8] sm:$0xf]  ;;  %961 = vrot.lane.b32.xlu1 %v953_v61, %s1445_s10  ;;  %v952_v63 = vld [vmem:[#allocation2] sm:$0xff] }
 0x58f   : > { %924 = vrot.lane.b32.xlu0 %v916_v62, %s1449_s23  ;;  %v956_v1 = vcombine.high %v952_v63, %v952_v63  ;;  %v807_v2 = vsel %vm1681_vm9, 0.0, %v952_v63  ;;  %v891_v3 = vld [vmem:[#allocation2 + $0x8] sm:$0xf]  ;;  %v938_v9 = vcombine.low %v952_v63, %v952_v63 }
 0x590   : > { %v849_v4 = vld [vmem:[#allocation2 + $0x8] sm:$0xf]  ;;  %809 = vst [vmem:[#allocation3 + $0x30] sm:$0xf] %v807_v2 }
 0x591   : > { %v808_v5 = vsel %vm1689_vm10, 0.0, %v956_v1  ;;  %v874_v15 = vld [vmem:[#allocation2 + $0x8] sm:$0xf] }
 0x592   : > { %899 = vrot.lane.b32.xlu1 %v891_v3, %s1447_s26  ;;  %810 = vst [vmem:[#allocation3] sm:$0xf] %v808_v5  ;;  %v830_v6 = vld [vmem:[#allocation2 + $0x8] sm:$0xf] }
 0x593   : > { %857 = vrot.lane.b32.xlu0 %v849_v4, %s1446_s12  ;;  %v1293_v7 = vld [vmem:[#allocation2 + $0x8] ss:$0 sps:$4 sm:$0xff]  }
 0x594   : > { %v1294_v8 = vld [vmem:[#allocation2 + $0x8] ss:$0 sps:$4 sm:$0xff]  }
 0x596   : > { %957 = vrot.lane.b32.xlu1 %v952_v63, %s1445_s10 }
 0x597   : > { %882 = vrot.lane.b32.xlu0 %v874_v15, %s1448_s25 }
 0x59a   : > { %895 = vrot.lane.b32.xlu1 %v952_v63, %s1447_s26 }
 0x59b   : > { %838 = vrot.lane.b32.xlu0 %v830_v6, %s1450_s7 }
 0x59e   : > { %942 = vrot.lane.b32.xlu1 %v952_v63, %s1451_s28 }
 0x59f   : > { %920 = vrot.lane.b32.xlu0 %v952_v63, %s1449_s23 }
 0x5a2   : > { %878 = vrot.lane.b32.xlu1 %v952_v63, %s1448_s25 }
 0x5a3   : > { %853 = vrot.lane.b32.xlu0 %v952_v63, %s1446_s12 }
 0x5a6   : > { %819 = vrot.lane.b32.xlu1 %v952_v63, %s1452_s9 }
 0x5a7   : > { %944 = vrot.lane.b32.xlu0 %v1293_v7, %s1451_s28 }
 0x5aa   : > { %959 = vrot.lane.b32.xlu1 %v956_v1, %s1445_s10 }
 0x5ab   : > { %834 = vrot.lane.b32.xlu0 %v952_v63, %s1450_s7 }
 0x5ae   : > { %897 = vrot.lane.b32.xlu1 %v956_v1, %s1447_s26  ;;  %s1209_s26 = sshll.u32 %s1508_s22, 7  ;;  %s1371_s22 = sshll.u32 %s1456_s15, 4  ;;  %s1372_s22 = int_to_ptr.vmem [resolvable:$false] %s1371_s22 }
 0x5af   : > { %821 = vrot.lane.b32.xlu0 %v1294_v8, %s1452_s9 }
 0x5b2   : > { %922 = vrot.lane.b32.xlu1 %v956_v1, %s1449_s23 }
 0x5b3   : > { %984 = vperm.xlu0 %1285, %v791_v12  }
 0x5b6   : > { %855 = vrot.lane.b32.xlu1 %v956_v1, %s1446_s12 }
 0x5ba   : > { %940 = vrot.lane.b32.xlu1 %v938_v9, %s1451_s28 }
 0x5be   : > { %880 = vrot.lane.b32.xlu1 %v956_v1, %s1448_s25  ;;  %s277_s25 = scalar_lea.vmem [#allocation9], %s1190_s16  ;;  %s1373_s16 = scalar_lea.vmem %s1372_s22, 256 }
 0x5bf   : > { %s1088_s23 = sshll.u32 %s277_s25, 4  ;;  %s1089_s23 = int_to_ptr.vmem [resolvable:$true] %s1088_s23 }
 0x5c0   : > { %s1367_s13 = scalar_lea.vmem %s1089_s23, 128  ;;  %p1374_p10 = scmp.lt.s32.totalorder %s1089_s23, %s1372_s22 }
 0x5c1   : > { %p1368_p13 = scmp.ne.s32.totalorder %s1089_s23, %s1367_s13  ;;  %p1375_p2 = scmp.lt.s32.totalorder %s1373_s16, %s1367_s13 }
 0x5c2   : > { %836 = vrot.lane.b32.xlu1 %v956_v1, %s1450_s7 }
 0x5c3   : > { %p1369_p7 = pnand %p1368_p13, %p1958_p3  ;;  %p1376_p4 = por %p1375_p2, %p1374_p10 }
 0x5c5   : > { %p1370_p8 = pneg %p1369_p7 }
 0x5c6   : > { %817 = vrot.lane.b32.xlu1 %v938_v9, %s1452_s9  ;;  %s1086_s9 = scalar_lea.hbm %s1927_s5, %s1209_s26 }
 0x5c7   : > { %p1377_p5 = pnand %p1376_p4, %p1370_p8 }
 0x600   : > { %v962_v13 = vpop.permute.xlu1 %961 }
 0x601   : > { %v925_v14 = vpop.permute.xlu0 %924 }
 0x604   : > { %v900_v16 = vpop.permute.xlu1 %899 }
 0x605   : > { %v858_v17 = vpop.permute.xlu0 %857 }
 0x608   : > { %v958_v19 = vpop.permute.xlu1 %957 }
 0x609   : > { %v883_v18 = vpop.permute.xlu0 %882 }
 0x60c   : > { %v896_v20 = vpop.permute.xlu1 %895 }
 0x60d   : > { %v1835_v10 = vpop.permute.xlu0 %838 }
 0x610   : > { %v943_v22 = vpop.permute.xlu1 %942 }
 0x611   : > { %v921_v21 = vpop.permute.xlu0 %920 }
 0x614   : > { %v879_v24 = vpop.permute.xlu1 %878 }
 0x615   : > { %v854_v26 = vpop.permute.xlu0 %853 }
 0x618   : > { %v1837_v28 = vpop.permute.xlu1 %819 }
 0x619   : > { %v945_v27 = vpop.permute.xlu0 %944 }
 0x61a   : > { %v947_v29 = vsel %vm594_vm11, %v943_v22, %v945_v27 }
 0x61b   : > { %951 = vst [vmem:[#allocation3 + $0x20] sm:$0xf0] %v947_v29 }
 0x61c   : > { %v960_v31 = vpop.permute.xlu1 %959 }
 0x61d   : > { %v835_v30 = vpop.permute.xlu0 %834  ;;  %v963_v32 = vsel %vm612_vm13, %v958_v19, %v960_v31  ;;  %v964_v33 = vsel %vm612_vm13, %v960_v31, %v962_v13  ;;  %v971_v13 = vld [vmem:[%s1925_s3] sm:$0xf] }
 0x61e   : > { %v967_v34 = vsel %vm1735_vm14, 0.0, %v963_v32  ;;  %v968_v35 = vsel %vm1741_vm15, 0.0, %v964_v33 }
 0x61f   : > { %969 = vst [vmem:[#allocation3 + $0x40] sm:$0xf] %v967_v34  ;;  %970 = vst [vmem:[#allocation3 + $0x38] sm:$0xf] %v968_v35 }
 0x620   : > { %v898_v37 = vpop.permute.xlu1 %897 }
 0x621   : > { %v822_v36 = vpop.permute.xlu0 %821  ;;  %v901_v39 = vsel %vm547_vm1, %v896_v20, %v898_v37  ;;  %v902_v40 = vsel %vm547_vm1, %v898_v37, %v900_v16 }
 0x622   : > { %v824_v38 = vsel %vm459_vm12, %v1837_v28, %v822_v36  ;;  %v905_v41 = vsel %vm1735_vm14, 0.0, %v901_v39  ;;  %v906_v42 = vsel %vm1741_vm15, 0.0, %v902_v40 }
 0x623   : > { %828 = vst [vmem:[#allocation3] sm:$0xf0] %v824_v38  ;;  %v909_v43 = vrot.slane %v905_v41, 4  ;;  %v910_v44 = vrot.slane %v906_v42, 4 }
 0x624   : > { %v923_v45 = vpop.permute.xlu1 %922 }
 0x625   : > { %913 = vst [vmem:[#allocation3 + $0x48] sm:$0xf0] %v909_v43  ;;  %914 = vst [vmem:[#allocation3 + $0x28] sm:$0xf0] %v910_v44  ;;  %v926_v46 = vsel %vm573_vm2, %v921_v21, %v923_v45  ;;  %v927_v11 = vsel %vm573_vm2, %v923_v45, %v925_v14 }
 0x626   : > { %v930_v47 = vsel %vm1681_vm9, 0.0, %v926_v46  ;;  %v931_v49 = vsel %vm1689_vm10, 0.0, %v927_v11  ;;  %v981_v51 = vld [vmem:[#allocation3 + $0x38] sm:$0xf]  ;;  %v980_v52 = vld [vmem:[#allocation3 + $0x40] sm:$0xf] }
 0x627   : > { %932 = vst [vmem:[#allocation3 + $0x8] sm:$0xf] %v930_v47  ;;  %933 = vst [vmem:[#allocation3 + $0x20] sm:$0xf] %v931_v49  ;;  %1200 = vmatprep.subr.msk.mxu1 %vm313_vm0, %v981_v51 }
 0x628   : > { %1201 = vmatpush1.msk.msra.mxu1 %vm313_vm0, %v980_v52  ;;  %v856_v53 = vpop.permute.xlu1 %855  ;;  %vm1953_vm0 = vcmask 908288  }
 0x629   : > { %v859_v48 = vsel %vm503_vm3, %v854_v26, %v856_v53  ;;  %v860_v50 = vsel %vm503_vm3, %v856_v53, %v858_v17  ;;  %vm1954_vm6 = vmmov %vm1953_vm0 }
 0x62a   : > { %v863_v54 = vsel %vm1681_vm9, 0.0, %v859_v48  ;;  %v864_v57 = vsel %vm1689_vm10, 0.0, %v860_v50  ;;  %v973_v56 = vld [vmem:[#allocation3] sm:$0xff]  ;;  %vm1957_vm9 = vcmask 293888  }
 0x62b   : > { %v867_v58 = vrot.slane %v863_v54, 4  ;;  %v868_v59 = vrot.slane %v864_v57, 4 }
 0x62c   : > { %v941_v60 = vpop.permute.xlu1 %940 }
 0x62d   : > { %871 = vst [vmem:[#allocation3 + $0x18] sm:$0xf0] %v867_v58  ;;  %872 = vst [vmem:[#allocation3 + $0x10] sm:$0xf0] %v868_v59  ;;  %v946_v61 = vsel %vm594_vm11, %v941_v60, %v943_v22 }
 0x62e   : > { %950 = vst [vmem:[#allocation3 + $0x8] sm:$0xf0] %v946_v61  ;;  %v979_v62 = vld [vmem:[#allocation3 + $0x20] sm:$0xff]  ;;  %v985_v16 = vpop.permute.xlu0 %984 }
 0x62f   : > { %1020 = vmatprep.subr.mxu1 %v979_v62 }
 0x630   : > { %v881_v63 = vpop.permute.xlu1 %880 }
 0x631   : > { %v884_v1 = vsel %vm1953_vm0, %v879_v24, %v881_v63  ;;  %v885_v2 = vsel %vm1954_vm6, %v881_v63, %v883_v18 }
 0x632   : > { %888 = vst [vmem:[#allocation3 + $0x48] sm:$0xf] %v884_v1  ;;  %889 = vst [vmem:[#allocation3 + $0x28] sm:$0xf] %v885_v2 }
 0x634   : > { %v837_v23 = vpop.permute.xlu1 %836 }
 0x635   : > { %v840_v25 = vsel %vm1955_vm7, %v835_v30, %v837_v23  ;;  %v841_v3 = vsel %vm1956_vm8, %v837_v23, %v1835_v10  ;;  %v978_v4 = vld [vmem:[#allocation3 + $0x8] sm:$0xff] }
 0x636   : > { %v844_v5 = vsel %vm1735_vm14, 0.0, %v840_v25  ;;  %v845_v15 = vsel %vm1741_vm15, 0.0, %v841_v3  ;;  %1021 = vmatpush1.msra.mxu1 %v978_v4 }
 0x637   : > { %846 = vst [vmem:[#allocation3 + $0x18] sm:$0xf] %v844_v5  ;;  %847 = vst [vmem:[#allocation3 + $0x10] sm:$0xf] %v845_v15 }
 0x638   : > { %v818_v6 = vpop.permute.xlu1 %817 }
 0x639   : > { %v823_v7 = vsel %vm459_vm12, %v818_v6, %v1837_v28  ;;  %v977_v8 = vld [vmem:[#allocation3 + $0x28] sm:$0xff] }
 0x63a   : > { %v976_v9 = vld [vmem:[#allocation3 + $0x48] sm:$0xff]  ;;  %827 = vst [vmem:[#allocation3 + $0x30] sm:$0xf0] %v823_v7  ;;  %1022 = vmatprep.subr.mxu1 %v977_v8 }
 0x63b   : > { %1023 = vmatpush1.msra.mxu1 %v976_v9 }
 0x63e   : > { %v975_v12 = vld [vmem:[#allocation3 + $0x10] sm:$0xff]  ;;  %v974_v55 = vld [vmem:[#allocation3 + $0x18] sm:$0xff] }
 0x63f   : > { %1024 = vmatprep.subr.mxu1 %v975_v12 }
 0x640   : > { %1025 = vmatpush1.msra.mxu1 %v974_v55 }
 0x641   : > { %1026 = vmatprep.subr.mxu1 %v973_v56  ;;  %v972_v14 = vld [vmem:[#allocation3 + $0x30] sm:$0xff] }
 0x642   : > { %1027 = vmatpush1.msra.mxu1 %v972_v14 }
 0x643   : > { %1202 = vmatmul.mubr.msk.f32.vlgmr.msra.gmra.mxu1 %vm1957_vm9, %v971_v13 }
 0x703   : > { %v1062_v17 = vpop.f32.mrf.mxu1 }
 0x704   : > { %v1063_v19 = vadd.f32 %v1062_v17, %v985_v16 }
 0x705   : > { %v1064_v18 = vpop.f32.mrf.mxu1 }
 0x706   : > { %v1065_v10 = vadd.f32 %v1064_v18, %v985_v16 }
 0x708   : > { %v1069_v20 = vcombine.low %v1063_v19, %v1065_v10 }
 0x70a   : > { %v1071_v21 = vadd.f32 %v1069_v20, %v1643_v0 }
 0x70c   : > { %1072 = vst [vmem:[%s277_s25] sm:$0xff] %v1071_v21 }
 0x70d   : > { %1380 = shalt.err (!%p1377_p5)
}
 0x70e   : > { %s1381_s17 = scalar_lea.hbm %s1086_s9, 128  ;;  %s1385_s29 = scalar_lea.hbm %s1927_s5, 256 }
 0x70f   : > { %p1382_p9 = scmp.ne.s32.totalorder %s1086_s9, %s1381_s17  ;;  %p1386_p12 = scmp.lt.s32.totalorder %s1086_s9, %s1927_s5 }
 0x710   : > { %p1387_p1 = scmp.lt.s32.totalorder %s1385_s29, %s1381_s17 }
 0x711   : > { %p1383_p0 = pnand %p1382_p9, %p1958_p3 }
 0x712   : > { %p1388_p6 = por %p1387_p1, %p1386_p12 }
 0x713   : > { %p1384_p11 = pneg %p1383_p0 }
 0x715   : > { %p1389_p13 = pnand %p1388_p6, %p1384_p11 }
 0x717   : > { %1392 = shalt.err (!%p1389_p13)
}
 0x718   : > { %1214 = dma.vmem_to_hbm [thread:$0]  (%p1958_p3), %s1089_s23, 128, %s1086_s9, %s1074_s11  }
 0x719 PF: > { %s1100_s26 = sand.u32 1, %s1423_s18   ;;  %p1959_p7 = scmp.ne.s32.totalorder %s1936_s6, 0 }
 0x71a   : > { %p1960_p8 = scmp.ge.s32.totalorder %s1435_s21, 2  ;;  %s1101_s25 = scalar_lea.sflag [#allocation6], %s1100_s26 }
 0x71c   : > { %p1224_p10 = pnand %p1960_p8, %p1959_p7 }
 0x71e   : > { %p1225_p2 = pneg %p1224_p10 }
 0x720   : > { %1418 = dma.done.wait (%p1225_p2), %s1101_s25, 128  }
 0x721   : > { %1420 = vsyncadd (%p1225_p2), %s1101_s25, 4294967168  ;;  %p21_p4 = scmp.ge.s32.totalorder %s1512_s24, 4   ;;  %s1961_s18 = smov %s1427_s19 }
 0x722   : > { %s1962_s19 = smov %s1431_s20  ;;  %s1963_s20 = smov %s1524_s27 }
 0x723   : > { %s1964_s21 = smov %s1512_s24  ;;  %23 = sbr.rel (!%p21_p4) target bundleno = 7 (0x7), region = 98 }
 0x728   :  { %1106 = vsyncpa [#allocation5], 1 }
 0x729   :  { %1108 = vsyncpa [#allocation5 + $0x1], 1 }
 0x72a   :  { %1109 = vsyncpa [#allocation8], 1 }
 0x72b   :  { %1111 = vsyncpa [#allocation8 + $0x1], 1 }
 0x72c   :  { %1112 = vsyncpa [#allocation6], 1 }
 0x72d   :  { %1114 = vsyncpa [#allocation6 + $0x1], 1 }

</bundles_post_ra>
